<compile_context>
chip_gen: v6e
topology: v6e:2x2x1
jax: 0.10.0
libtpu: 0.0.40
codegen_flags: <defaults>
</compile_context>

<pallas_src>
import functools

import numpy as np
import jax
import jax.numpy as jnp
from jax.experimental import pallas as pl
from jax.experimental.pallas import tpu as pltpu


def _offmap(phase, tap):
    """Padded source row/col offset (relative to i or j) read by output phase
    `phase` (0/1) at 3x3-conv tap `tap` (0/1/2) of the fused upsample+conv."""
    return (phase + tap + 1) // 2          # always in {phase, phase + 1}


def _enumerate_passes(C):
    """Static FMA-pass schedule, shared by the weight folding and the kernel.

    Each pass is (dr, s, a, b):
      dr : padded source-row offset   (row window  x[i+dr, :])
      s  : absolute lane-slice start  (lane window xr[:, s:s+W*C])
      a  : output row phase           (output row 2i+a)
      b  : output col phase           (output col 2j+b)
    """
    passes = []
    for dr in range(3):
        for s in range(1, 4 * C):
            for a in (0, 1):
                if dr not in (a, a + 1):
                    continue
                for b in (0, 1):
                    if not (b * C + 1 <= s <= b * C + 3 * C - 1):
                        continue
                    passes.append((dr, s, a, b))
    return passes


def _fold_weights(w_hwio, W):
    """Fold the 3x3 HWIO weights into one lane-tiled coefficient row per pass."""
    KH, KW, C, Co = w_hwio.shape
    assert (KH, KW) == (3, 3) and C == Co
    passes = _enumerate_passes(C)
    sel = np.zeros((len(passes), 3, 3, C, C), np.float32)
    for r, (dr, s, a, b) in enumerate(passes):
        for kh in range(3):
            if _offmap(a, kh) != dr:
                continue
            for kw in range(3):
                dc = _offmap(b, kw)
                for co in range(C):
                    ci = s - C - dc * C + co
                    if 0 <= ci < C:
                        sel[r, kh, kw, ci, co] = 1.0
    coef = jnp.einsum('rkqic,kqic->rc', jnp.asarray(sel),
                      w_hwio.astype(jnp.float32))            # (R, C)
    # TODO(synk): for large C store coef with period lcm(C, 128) instead of
    #             tiling by W (coef grows as W*C^2 and can blow past VMEM).
    return jnp.tile(coef, (1, W))                            # (R, W*C)


def _pick_block_batch(N, bytes_per_image, target_bytes=512 * 1024):
    """Batch elements per grid step: big enough blocks, but keep >=2 steps."""
    divisors = [d for d in range(1, N + 1) if N % d == 0]
    fitting = [d for d in divisors if d * bytes_per_image <= target_bytes]
    if not fitting:
        return 1
    multi_step = [d for d in fitting if N // d >= 2]
    return max(multi_step) if multi_step else max(fitting)


def _upsample_conv_kernel(x_ref, coef_ref, bias_ref, o_ref, *, Nb, H, W, C):
    """Fused nearest-2x upsample + 3x3 conv, full 2x2 phase decomposition.

    x_ref   : (Nb, H+2, XEWp)  1-px zero-padded original-resolution input,
              lane layout: [C zero lanes | (W+2)*C padded row | zeros to XEWp]
    coef_ref: (R, W*C)         folded per-pass lane coefficients (f32)
    bias_ref: (1, 4*W*C)       lane-tiled bias (f32)
    o_ref   : (Nb, H, 4*W*C)   lane order (a, b, j, co): phase slab (a, b) of
              source row i holds output pixel (2i+a, 2j+b)
    """
    WC = W * C
    passes = _enumerate_passes(C)

    coef_all = coef_ref[...]                   # single block load per grid step
    bias_row = bias_ref[...]                   # (1, 4*W*C)

    for nb in range(Nb):
        acc = {(a, b): jnp.zeros((H, WC), jnp.float32)
               for a in (0, 1) for b in (0, 1)}
        cur_dr, cur_s = -1, -1
        xr = None
        shifted = None
        for row_id, (dr, s, a, b) in enumerate(passes):
            if dr != cur_dr:                                   # 3 row windows / image
                xr = x_ref[nb, dr:dr + H, :].astype(jnp.float32)
                cur_dr, cur_s = dr, -1
            if s != cur_s:                                     # shared lane window
                shifted = xr[:, s:s + WC]                      # (H, WC), static slice
                cur_s = s
            coef = coef_all[row_id:row_id + 1, :]              # (1, WC), value slice
            acc[(a, b)] = acc[(a, b)] + coef * shifted         # VPU FMA, f32 acc
        out_row = jnp.concatenate(
            [acc[(0, 0)], acc[(0, 1)], acc[(1, 0)], acc[(1, 1)]], axis=-1)
        o_ref[nb, :, :] = (out_row + bias_row).astype(o_ref.dtype)


def upsample_forward(x_nchw, w_hwio, bias):
    """PyTorch-equivalent forward: (N, C, H, W) -> (N, C, 2H, 2W)."""
    N, C, H, W = x_nchw.shape
    Ho, Wo = 2 * H, 2 * W
    WC = W * C
    R = len(_enumerate_passes(C))
    XEW = (W + 4) * C
    XEWp = -(-XEW // 128) * 128            # lane-dense: pad to multiple of 128

    # Layout glue (one fused XLA copy): NCHW->NHWC, 1-px zero pad, C-lane halo,
    # pad to 128 lanes.  Original resolution only; the upsample is never
    # materialized.
    x_nhwc = jnp.transpose(x_nchw, (0, 2, 3, 1))                 # (N, H, W, C)
    x_pad = jnp.pad(x_nhwc, ((0, 0), (1, 1), (2, 2), (0, 0)))    # (N, H+2, W+4, C)
    x_in = x_pad.reshape(N, H + 2, XEW)
    if XEWp > XEW:
        x_in = jnp.pad(x_in, ((0, 0), (0, 0), (0, XEWp - XEW)))

    coef = _fold_weights(w_hwio, W)                              # (R, WC) f32
    bias_row = jnp.tile(bias.astype(jnp.float32), 4 * W).reshape(1, 4 * WC)

    itemsize = jnp.dtype(x_nchw.dtype).itemsize
    bytes_per_image = (H + 2) * XEWp * itemsize + H * 4 * WC * itemsize
    Nb = _pick_block_batch(N, bytes_per_image)

    kernel = functools.partial(_upsample_conv_kernel, Nb=Nb, H=H, W=W, C=C)

    flops = 2 * 4 * C * N * Ho * Wo * C          # 2x2 effective taps per phase
    bytes_accessed = (x_in.size * itemsize + coef.size * 4 + bias_row.size * 4
                      + N * H * 4 * WC * itemsize)

    out = pl.pallas_call(
        kernel,
        out_shape=jax.ShapeDtypeStruct((N, H, 4 * WC), x_nchw.dtype),
        grid=(N // Nb,),
        in_specs=[
            pl.BlockSpec((Nb, H + 2, XEWp), lambda n: (n, 0, 0)),
            pl.BlockSpec((R, WC), lambda n: (0, 0)),
            pl.BlockSpec((1, 4 * WC), lambda n: (0, 0)),
        ],
        out_specs=pl.BlockSpec((Nb, H, 4 * WC), lambda n: (n, 0, 0)),
        compiler_params=pltpu.CompilerParams(
            dimension_semantics=("parallel",)),
        cost_estimate=pl.CostEstimate(
            flops=flops, transcendentals=0, bytes_accessed=bytes_accessed),
    )(x_in, coef, bias_row)

    # Phase de-interleave + NHWC->NCHW: fuses into the single output transpose.
    y = out.reshape(N, H, 2, 2, W, C)
    y = jnp.transpose(y, (0, 1, 2, 4, 3, 5)).reshape(N, Ho, Wo, C)
    return jnp.transpose(y, (0, 3, 1, 2))


def reference_forward(x_nchw, w_hwio, bias):
    """Pure-JAX reference (nearest 2x upsample + SAME conv)."""
    x_up = jnp.repeat(jnp.repeat(x_nchw, 2, axis=2), 2, axis=3)
    out = jax.lax.conv_general_dilated(
        x_up, w_hwio, window_strides=(1, 1), padding='SAME',
        dimension_numbers=('NCHW', 'HWIO', 'NCHW'))
    return out + bias[None, :, None, None]


def _run_case(key, N, C, H, W):
    k_x, k_w, k_b = jax.random.split(key, 3)
    x = jax.random.normal(k_x, (N, C, H, W), dtype=jnp.float32)

    # nn.Conv2d default init: uniform(-1/sqrt(fan_in), 1/sqrt(fan_in)).
    fan_in = C * 3 * 3
    bound = 1.0 / (fan_in ** 0.5)
    w_hwio = jax.random.uniform(k_w, (3, 3, C, C), jnp.float32, -bound, bound)
    bias = jax.random.uniform(k_b, (C,), jnp.float32, -bound, bound)

    out = jax.jit(upsample_forward)(x, w_hwio, bias)
    out = jax.block_until_ready(out)

    ref = reference_forward(x, w_hwio, bias)
    assert out.shape == (N, C, 2 * H, 2 * W)
    assert jnp.allclose(out, ref, atol=1e-4, rtol=1e-4), \
        f"mismatch vs reference for shape {(N, C, H, W)}"


if __name__ == "__main__":
    key = jax.random.PRNGKey(0)
    k0, k1, k2 = jax.random.split(key, 3)
    _run_case(k0, N=2, C=4, H=16, W=16)   # nominal small shape, grid of 2 steps
    _run_case(k1, N=1, C=8, H=8, W=8)     # different C exercises weight folding
    _run_case(k2, N=4, C=4, H=8, W=8)     # exercises Nb=2 batched grid steps
    print("KERNEL_OK")
</pallas_src>

<mosaic_0001>
module attributes {stable_mosaic.version = 11 : i64} {
  func.func @_upsample_conv_kernel(%arg0: i32, %arg1: memref<1x18x128xf32, #tpu.memory_space<vmem>>, %arg2: memref<88x64xf32, #tpu.memory_space<vmem>>, %arg3: memref<1x256xf32, #tpu.memory_space<vmem>>, %arg4: memref<1x16x256xf32, #tpu.memory_space<vmem>>) attributes {dimension_semantics = [#tpu.dimension_semantics<parallel>], iteration_bounds = array<i64: 2>, scalar_prefetch = 0 : i64, scratch_operands = 0 : i64, tpu.core_type = #tpu.core_type<tc>, window_params = [{transform_indices = @transform_0, window_bounds = array<i64: 1, 18, 128>}, {pipeline_mode = #tpu.pipeline_mode<synchronous>, transform_indices = @transform_1, window_bounds = array<i64: 88, 64>}, {pipeline_mode = #tpu.pipeline_mode<synchronous>, transform_indices = @transform_2, window_bounds = array<i64: 1, 256>}, {transform_indices = @transform_3, window_bounds = array<i64: 1, 16, 256>}]} {
    %c0 = arith.constant 0 : index
    %c0_0 = arith.constant 0 : index
    %0 = vector.load %arg2[%c0, %c0_0] : memref<88x64xf32, #tpu.memory_space<vmem>>, vector<88x64xf32>
    %c0_1 = arith.constant 0 : index
    %c0_2 = arith.constant 0 : index
    %1 = vector.load %arg3[%c0_1, %c0_2] : memref<1x256xf32, #tpu.memory_space<vmem>>, vector<1x256xf32>
    %cst = arith.constant 0.000000e+00 : f32
    %2 = vector.broadcast %cst : f32 to vector<16x64xf32>
    %cst_3 = arith.constant 0.000000e+00 : f32
    %3 = vector.broadcast %cst_3 : f32 to vector<16x64xf32>
    %cst_4 = arith.constant 0.000000e+00 : f32
    %4 = vector.broadcast %cst_4 : f32 to vector<16x64xf32>
    %cst_5 = arith.constant 0.000000e+00 : f32
    %5 = vector.broadcast %cst_5 : f32 to vector<16x64xf32>
    %c0_6 = arith.constant 0 : index
    %c0_7 = arith.constant 0 : index
    %c0_8 = arith.constant 0 : index
    %6 = vector.load %arg1[%c0_6, %c0_7, %c0_8] : memref<1x18x128xf32, #tpu.memory_space<vmem>>, vector<1x16x128xf32>
    %7 = vector.shape_cast %6 : vector<1x16x128xf32> to vector<16x128xf32>
    %8 = vector.extract_strided_slice %7 {offsets = [0, 1], sizes = [16, 64], strides = [1, 1]} : vector<16x128xf32> to vector<16x64xf32>
    %9 = vector.extract_strided_slice %0 {offsets = [0, 0], sizes = [1, 64], strides = [1, 1]} : vector<88x64xf32> to vector<1x64xf32>
    %10 = vector.broadcast %9 : vector<1x64xf32> to vector<16x64xf32>
    %11 = arith.mulf %10, %8 : vector<16x64xf32>
    %12 = arith.addf %2, %11 : vector<16x64xf32>
    %13 = vector.extract_strided_slice %7 {offsets = [0, 2], sizes = [16, 64], strides = [1, 1]} : vector<16x128xf32> to vector<16x64xf32>
    %14 = vector.extract_strided_slice %0 {offsets = [1, 0], sizes = [1, 64], strides = [1, 1]} : vector<88x64xf32> to vector<1x64xf32>
    %15 = vector.broadcast %14 : vector<1x64xf32> to vector<16x64xf32>
    %16 = arith.mulf %15, %13 : vector<16x64xf32>
    %17 = arith.addf %12, %16 : vector<16x64xf32>
    %18 = vector.extract_strided_slice %7 {offsets = [0, 3], sizes = [16, 64], strides = [1, 1]} : vector<16x128xf32> to vector<16x64xf32>
    %19 = vector.extract_strided_slice %0 {offsets = [2, 0], sizes = [1, 64], strides = [1, 1]} : vector<88x64xf32> to vector<1x64xf32>
    %20 = vector.broadcast %19 : vector<1x64xf32> to vector<16x64xf32>
    %21 = arith.mulf %20, %18 : vector<16x64xf32>
    %22 = arith.addf %17, %21 : vector<16x64xf32>
    %23 = vector.extract_strided_slice %7 {offsets = [0, 4], sizes = [16, 64], strides = [1, 1]} : vector<16x128xf32> to vector<16x64xf32>
    %24 = vector.extract_strided_slice %0 {offsets = [3, 0], sizes = [1, 64], strides = [1, 1]} : vector<88x64xf32> to vector<1x64xf32>
    %25 = vector.broadcast %24 : vector<1x64xf32> to vector<16x64xf32>
    %26 = arith.mulf %25, %23 : vector<16x64xf32>
    %27 = arith.addf %22, %26 : vector<16x64xf32>
    %28 = vector.extract_strided_slice %7 {offsets = [0, 5], sizes = [16, 64], strides = [1, 1]} : vector<16x128xf32> to vector<16x64xf32>
    %29 = vector.extract_strided_slice %0 {offsets = [4, 0], sizes = [1, 64], strides = [1, 1]} : vector<88x64xf32> to vector<1x64xf32>
    %30 = vector.broadcast %29 : vector<1x64xf32> to vector<16x64xf32>
    %31 = arith.mulf %30, %28 : vector<16x64xf32>
    %32 = arith.addf %27, %31 : vector<16x64xf32>
    %33 = vector.extract_strided_slice %0 {offsets = [5, 0], sizes = [1, 64], strides = [1, 1]} : vector<88x64xf32> to vector<1x64xf32>
    %34 = vector.broadcast %33 : vector<1x64xf32> to vector<16x64xf32>
    %35 = arith.mulf %34, %28 : vector<16x64xf32>
    %36 = arith.addf %3, %35 : vector<16x64xf32>
    %37 = vector.extract_strided_slice %7 {offsets = [0, 6], sizes = [16, 64], strides = [1, 1]} : vector<16x128xf32> to vector<16x64xf32>
    %38 = vector.extract_strided_slice %0 {offsets = [6, 0], sizes = [1, 64], strides = [1, 1]} : vector<88x64xf32> to vector<1x64xf32>
    %39 = vector.broadcast %38 : vector<1x64xf32> to vector<16x64xf32>
    %40 = arith.mulf %39, %37 : vector<16x64xf32>
    %41 = arith.addf %32, %40 : vector<16x64xf32>
    %42 = vector.extract_strided_slice %0 {offsets = [7, 0], sizes = [1, 64], strides = [1, 1]} : vector<88x64xf32> to vector<1x64xf32>
    %43 = vector.broadcast %42 : vector<1x64xf32> to vector<16x64xf32>
    %44 = arith.mulf %43, %37 : vector<16x64xf32>
    %45 = arith.addf %36, %44 : vector<16x64xf32>
    %46 = vector.extract_strided_slice %7 {offsets = [0, 7], sizes = [16, 64], strides = [1, 1]} : vector<16x128xf32> to vector<16x64xf32>
    %47 = vector.extract_strided_slice %0 {offsets = [8, 0], sizes = [1, 64], strides = [1, 1]} : vector<88x64xf32> to vector<1x64xf32>
    %48 = vector.broadcast %47 : vector<1x64xf32> to vector<16x64xf32>
    %49 = arith.mulf %48, %46 : vector<16x64xf32>
    %50 = arith.addf %41, %49 : vector<16x64xf32>
    %51 = vector.extract_strided_slice %0 {offsets = [9, 0], sizes = [1, 64], strides = [1, 1]} : vector<88x64xf32> to vector<1x64xf32>
    %52 = vector.broadcast %51 : vector<1x64xf32> to vector<16x64xf32>
    %53 = arith.mulf %52, %46 : vector<16x64xf32>
    %54 = arith.addf %45, %53 : vector<16x64xf32>
    %55 = vector.extract_strided_slice %7 {offsets = [0, 8], sizes = [16, 64], strides = [1, 1]} : vector<16x128xf32> to vector<16x64xf32>
    %56 = vector.extract_strided_slice %0 {offsets = [10, 0], sizes = [1, 64], strides = [1, 1]} : vector<88x64xf32> to vector<1x64xf32>
    %57 = vector.broadcast %56 : vector<1x64xf32> to vector<16x64xf32>
    %58 = arith.mulf %57, %55 : vector<16x64xf32>
    %59 = arith.addf %50, %58 : vector<16x64xf32>
    %60 = vector.extract_strided_slice %0 {offsets = [11, 0], sizes = [1, 64], strides = [1, 1]} : vector<88x64xf32> to vector<1x64xf32>
    %61 = vector.broadcast %60 : vector<1x64xf32> to vector<16x64xf32>
    %62 = arith.mulf %61, %55 : vector<16x64xf32>
    %63 = arith.addf %54, %62 : vector<16x64xf32>
    %64 = vector.extract_strided_slice %7 {offsets = [0, 9], sizes = [16, 64], strides = [1, 1]} : vector<16x128xf32> to vector<16x64xf32>
    %65 = vector.extract_strided_slice %0 {offsets = [12, 0], sizes = [1, 64], strides = [1, 1]} : vector<88x64xf32> to vector<1x64xf32>
    %66 = vector.broadcast %65 : vector<1x64xf32> to vector<16x64xf32>
    %67 = arith.mulf %66, %64 : vector<16x64xf32>
    %68 = arith.addf %59, %67 : vector<16x64xf32>
    %69 = vector.extract_strided_slice %0 {offsets = [13, 0], sizes = [1, 64], strides = [1, 1]} : vector<88x64xf32> to vector<1x64xf32>
    %70 = vector.broadcast %69 : vector<1x64xf32> to vector<16x64xf32>
    %71 = arith.mulf %70, %64 : vector<16x64xf32>
    %72 = arith.addf %63, %71 : vector<16x64xf32>
    %73 = vector.extract_strided_slice %7 {offsets = [0, 10], sizes = [16, 64], strides = [1, 1]} : vector<16x128xf32> to vector<16x64xf32>
    %74 = vector.extract_strided_slice %0 {offsets = [14, 0], sizes = [1, 64], strides = [1, 1]} : vector<88x64xf32> to vector<1x64xf32>
    %75 = vector.broadcast %74 : vector<1x64xf32> to vector<16x64xf32>
    %76 = arith.mulf %75, %73 : vector<16x64xf32>
    %77 = arith.addf %68, %76 : vector<16x64xf32>
    %78 = vector.extract_strided_slice %0 {offsets = [15, 0], sizes = [1, 64], strides = [1, 1]} : vector<88x64xf32> to vector<1x64xf32>
    %79 = vector.broadcast %78 : vector<1x64xf32> to vector<16x64xf32>
    %80 = arith.mulf %79, %73 : vector<16x64xf32>
    %81 = arith.addf %72, %80 : vector<16x64xf32>
    %82 = vector.extract_strided_slice %7 {offsets = [0, 11], sizes = [16, 64], strides = [1, 1]} : vector<16x128xf32> to vector<16x64xf32>
    %83 = vector.extract_strided_slice %0 {offsets = [16, 0], sizes = [1, 64], strides = [1, 1]} : vector<88x64xf32> to vector<1x64xf32>
    %84 = vector.broadcast %83 : vector<1x64xf32> to vector<16x64xf32>
    %85 = arith.mulf %84, %82 : vector<16x64xf32>
    %86 = arith.addf %77, %85 : vector<16x64xf32>
    %87 = vector.extract_strided_slice %0 {offsets = [17, 0], sizes = [1, 64], strides = [1, 1]} : vector<88x64xf32> to vector<1x64xf32>
    %88 = vector.broadcast %87 : vector<1x64xf32> to vector<16x64xf32>
    %89 = arith.mulf %88, %82 : vector<16x64xf32>
    %90 = arith.addf %81, %89 : vector<16x64xf32>
    %91 = vector.extract_strided_slice %7 {offsets = [0, 12], sizes = [16, 64], strides = [1, 1]} : vector<16x128xf32> to vector<16x64xf32>
    %92 = vector.extract_strided_slice %0 {offsets = [18, 0], sizes = [1, 64], strides = [1, 1]} : vector<88x64xf32> to vector<1x64xf32>
    %93 = vector.broadcast %92 : vector<1x64xf32> to vector<16x64xf32>
    %94 = arith.mulf %93, %91 : vector<16x64xf32>
    %95 = arith.addf %90, %94 : vector<16x64xf32>
    %96 = vector.extract_strided_slice %7 {offsets = [0, 13], sizes = [16, 64], strides = [1, 1]} : vector<16x128xf32> to vector<16x64xf32>
    %97 = vector.extract_strided_slice %0 {offsets = [19, 0], sizes = [1, 64], strides = [1, 1]} : vector<88x64xf32> to vector<1x64xf32>
    %98 = vector.broadcast %97 : vector<1x64xf32> to vector<16x64xf32>
    %99 = arith.mulf %98, %96 : vector<16x64xf32>
    %100 = arith.addf %95, %99 : vector<16x64xf32>
    %101 = vector.extract_strided_slice %7 {offsets = [0, 14], sizes = [16, 64], strides = [1, 1]} : vector<16x128xf32> to vector<16x64xf32>
    %102 = vector.extract_strided_slice %0 {offsets = [20, 0], sizes = [1, 64], strides = [1, 1]} : vector<88x64xf32> to vector<1x64xf32>
    %103 = vector.broadcast %102 : vector<1x64xf32> to vector<16x64xf32>
    %104 = arith.mulf %103, %101 : vector<16x64xf32>
    %105 = arith.addf %100, %104 : vector<16x64xf32>
    %106 = vector.extract_strided_slice %7 {offsets = [0, 15], sizes = [16, 64], strides = [1, 1]} : vector<16x128xf32> to vector<16x64xf32>
    %107 = vector.extract_strided_slice %0 {offsets = [21, 0], sizes = [1, 64], strides = [1, 1]} : vector<88x64xf32> to vector<1x64xf32>
    %108 = vector.broadcast %107 : vector<1x64xf32> to vector<16x64xf32>
    %109 = arith.mulf %108, %106 : vector<16x64xf32>
    %110 = arith.addf %105, %109 : vector<16x64xf32>
    %c0_9 = arith.constant 0 : index
    %c1 = arith.constant 1 : index
    %c0_10 = arith.constant 0 : index
    %111 = vector.load %arg1[%c0_9, %c1, %c0_10] : memref<1x18x128xf32, #tpu.memory_space<vmem>>, vector<1x16x128xf32>
    %112 = vector.shape_cast %111 : vector<1x16x128xf32> to vector<16x128xf32>
    %113 = vector.extract_strided_slice %112 {offsets = [0, 1], sizes = [16, 64], strides = [1, 1]} : vector<16x128xf32> to vector<16x64xf32>
    %114 = vector.extract_strided_slice %0 {offsets = [22, 0], sizes = [1, 64], strides = [1, 1]} : vector<88x64xf32> to vector<1x64xf32>
    %115 = vector.broadcast %114 : vector<1x64xf32> to vector<16x64xf32>
    %116 = arith.mulf %115, %113 : vector<16x64xf32>
    %117 = arith.addf %86, %116 : vector<16x64xf32>
    %118 = vector.extract_strided_slice %0 {offsets = [23, 0], sizes = [1, 64], strides = [1, 1]} : vector<88x64xf32> to vector<1x64xf32>
    %119 = vector.broadcast %118 : vector<1x64xf32> to vector<16x64xf32>
    %120 = arith.mulf %119, %113 : vector<16x64xf32>
    %121 = arith.addf %4, %120 : vector<16x64xf32>
    %122 = vector.extract_strided_slice %112 {offsets = [0, 2], sizes = [16, 64], strides = [1, 1]} : vector<16x128xf32> to vector<16x64xf32>
    %123 = vector.extract_strided_slice %0 {offsets = [24, 0], sizes = [1, 64], strides = [1, 1]} : vector<88x64xf32> to vector<1x64xf32>
    %124 = vector.broadcast %123 : vector<1x64xf32> to vector<16x64xf32>
    %125 = arith.mulf %124, %122 : vector<16x64xf32>
    %126 = arith.addf %117, %125 : vector<16x64xf32>
    %127 = vector.extract_strided_slice %0 {offsets = [25, 0], sizes = [1, 64], strides = [1, 1]} : vector<88x64xf32> to vector<1x64xf32>
    %128 = vector.broadcast %127 : vector<1x64xf32> to vector<16x64xf32>
    %129 = arith.mulf %128, %122 : vector<16x64xf32>
    %130 = arith.addf %121, %129 : vector<16x64xf32>
    %131 = vector.extract_strided_slice %112 {offsets = [0, 3], sizes = [16, 64], strides = [1, 1]} : vector<16x128xf32> to vector<16x64xf32>
    %132 = vector.extract_strided_slice %0 {offsets = [26, 0], sizes = [1, 64], strides = [1, 1]} : vector<88x64xf32> to vector<1x64xf32>
    %133 = vector.broadcast %132 : vector<1x64xf32> to vector<16x64xf32>
    %134 = arith.mulf %133, %131 : vector<16x64xf32>
    %135 = arith.addf %126, %134 : vector<16x64xf32>
    %136 = vector.extract_strided_slice %0 {offsets = [27, 0], sizes = [1, 64], strides = [1, 1]} : vector<88x64xf32> to vector<1x64xf32>
    %137 = vector.broadcast %136 : vector<1x64xf32> to vector<16x64xf32>
    %138 = arith.mulf %137, %131 : vector<16x64xf32>
    %139 = arith.addf %130, %138 : vector<16x64xf32>
    %140 = vector.extract_strided_slice %112 {offsets = [0, 4], sizes = [16, 64], strides = [1, 1]} : vector<16x128xf32> to vector<16x64xf32>
    %141 = vector.extract_strided_slice %0 {offsets = [28, 0], sizes = [1, 64], strides = [1, 1]} : vector<88x64xf32> to vector<1x64xf32>
    %142 = vector.broadcast %141 : vector<1x64xf32> to vector<16x64xf32>
    %143 = arith.mulf %142, %140 : vector<16x64xf32>
    %144 = arith.addf %135, %143 : vector<16x64xf32>
    %145 = vector.extract_strided_slice %0 {offsets = [29, 0], sizes = [1, 64], strides = [1, 1]} : vector<88x64xf32> to vector<1x64xf32>
    %146 = vector.broadcast %145 : vector<1x64xf32> to vector<16x64xf32>
    %147 = arith.mulf %146, %140 : vector<16x64xf32>
    %148 = arith.addf %139, %147 : vector<16x64xf32>
    %149 = vector.extract_strided_slice %112 {offsets = [0, 5], sizes = [16, 64], strides = [1, 1]} : vector<16x128xf32> to vector<16x64xf32>
    %150 = vector.extract_strided_slice %0 {offsets = [30, 0], sizes = [1, 64], strides = [1, 1]} : vector<88x64xf32> to vector<1x64xf32>
    %151 = vector.broadcast %150 : vector<1x64xf32> to vector<16x64xf32>
    %152 = arith.mulf %151, %149 : vector<16x64xf32>
    %153 = arith.addf %144, %152 : vector<16x64xf32>
    %154 = vector.extract_strided_slice %0 {offsets = [31, 0], sizes = [1, 64], strides = [1, 1]} : vector<88x64xf32> to vector<1x64xf32>
    %155 = vector.broadcast %154 : vector<1x64xf32> to vector<16x64xf32>
    %156 = arith.mulf %155, %149 : vector<16x64xf32>
    %157 = arith.addf %110, %156 : vector<16x64xf32>
    %158 = vector.extract_strided_slice %0 {offsets = [32, 0], sizes = [1, 64], strides = [1, 1]} : vector<88x64xf32> to vector<1x64xf32>
    %159 = vector.broadcast %158 : vector<1x64xf32> to vector<16x64xf32>
    %160 = arith.mulf %159, %149 : vector<16x64xf32>
    %161 = arith.addf %148, %160 : vector<16x64xf32>
    %162 = vector.extract_strided_slice %0 {offsets = [33, 0], sizes = [1, 64], strides = [1, 1]} : vector<88x64xf32> to vector<1x64xf32>
    %163 = vector.broadcast %162 : vector<1x64xf32> to vector<16x64xf32>
    %164 = arith.mulf %163, %149 : vector<16x64xf32>
    %165 = arith.addf %5, %164 : vector<16x64xf32>
    %166 = vector.extract_strided_slice %112 {offsets = [0, 6], sizes = [16, 64], strides = [1, 1]} : vector<16x128xf32> to vector<16x64xf32>
    %167 = vector.extract_strided_slice %0 {offsets = [34, 0], sizes = [1, 64], strides = [1, 1]} : vector<88x64xf32> to vector<1x64xf32>
    %168 = vector.broadcast %167 : vector<1x64xf32> to vector<16x64xf32>
    %169 = arith.mulf %168, %166 : vector<16x64xf32>
    %170 = arith.addf %153, %169 : vector<16x64xf32>
    %171 = vector.extract_strided_slice %0 {offsets = [35, 0], sizes = [1, 64], strides = [1, 1]} : vector<88x64xf32> to vector<1x64xf32>
    %172 = vector.broadcast %171 : vector<1x64xf32> to vector<16x64xf32>
    %173 = arith.mulf %172, %166 : vector<16x64xf32>
    %174 = arith.addf %157, %173 : vector<16x64xf32>
    %175 = vector.extract_strided_slice %0 {offsets = [36, 0], sizes = [1, 64], strides = [1, 1]} : vector<88x64xf32> to vector<1x64xf32>
    %176 = vector.broadcast %175 : vector<1x64xf32> to vector<16x64xf32>
    %177 = arith.mulf %176, %166 : vector<16x64xf32>
    %178 = arith.addf %161, %177 : vector<16x64xf32>
    %179 = vector.extract_strided_slice %0 {offsets = [37, 0], sizes = [1, 64], strides = [1, 1]} : vector<88x64xf32> to vector<1x64xf32>
    %180 = vector.broadcast %179 : vector<1x64xf32> to vector<16x64xf32>
    %181 = arith.mulf %180, %166 : vector<16x64xf32>
    %182 = arith.addf %165, %181 : vector<16x64xf32>
    %183 = vector.extract_strided_slice %112 {offsets = [0, 7], sizes = [16, 64], strides = [1, 1]} : vector<16x128xf32> to vector<16x64xf32>
    %184 = vector.extract_strided_slice %0 {offsets = [38, 0], sizes = [1, 64], strides = [1, 1]} : vector<88x64xf32> to vector<1x64xf32>
    %185 = vector.broadcast %184 : vector<1x64xf32> to vector<16x64xf32>
    %186 = arith.mulf %185, %183 : vector<16x64xf32>
    %187 = arith.addf %170, %186 : vector<16x64xf32>
    %188 = vector.extract_strided_slice %0 {offsets = [39, 0], sizes = [1, 64], strides = [1, 1]} : vector<88x64xf32> to vector<1x64xf32>
    %189 = vector.broadcast %188 : vector<1x64xf32> to vector<16x64xf32>
    %190 = arith.mulf %189, %183 : vector<16x64xf32>
    %191 = arith.addf %174, %190 : vector<16x64xf32>
    %192 = vector.extract_strided_slice %0 {offsets = [40, 0], sizes = [1, 64], strides = [1, 1]} : vector<88x64xf32> to vector<1x64xf32>
    %193 = vector.broadcast %192 : vector<1x64xf32> to vector<16x64xf32>
    %194 = arith.mulf %193, %183 : vector<16x64xf32>
    %195 = arith.addf %178, %194 : vector<16x64xf32>
    %196 = vector.extract_strided_slice %0 {offsets = [41, 0], sizes = [1, 64], strides = [1, 1]} : vector<88x64xf32> to vector<1x64xf32>
    %197 = vector.broadcast %196 : vector<1x64xf32> to vector<16x64xf32>
    %198 = arith.mulf %197, %183 : vector<16x64xf32>
    %199 = arith.addf %182, %198 : vector<16x64xf32>
    %200 = vector.extract_strided_slice %112 {offsets = [0, 8], sizes = [16, 64], strides = [1, 1]} : vector<16x128xf32> to vector<16x64xf32>
    %201 = vector.extract_strided_slice %0 {offsets = [42, 0], sizes = [1, 64], strides = [1, 1]} : vector<88x64xf32> to vector<1x64xf32>
    %202 = vector.broadcast %201 : vector<1x64xf32> to vector<16x64xf32>
    %203 = arith.mulf %202, %200 : vector<16x64xf32>
    %204 = arith.addf %187, %203 : vector<16x64xf32>
    %205 = vector.extract_strided_slice %0 {offsets = [43, 0], sizes = [1, 64], strides = [1, 1]} : vector<88x64xf32> to vector<1x64xf32>
    %206 = vector.broadcast %205 : vector<1x64xf32> to vector<16x64xf32>
    %207 = arith.mulf %206, %200 : vector<16x64xf32>
    %208 = arith.addf %191, %207 : vector<16x64xf32>
    %209 = vector.extract_strided_slice %0 {offsets = [44, 0], sizes = [1, 64], strides = [1, 1]} : vector<88x64xf32> to vector<1x64xf32>
    %210 = vector.broadcast %209 : vector<1x64xf32> to vector<16x64xf32>
    %211 = arith.mulf %210, %200 : vector<16x64xf32>
    %212 = arith.addf %195, %211 : vector<16x64xf32>
    %213 = vector.extract_strided_slice %0 {offsets = [45, 0], sizes = [1, 64], strides = [1, 1]} : vector<88x64xf32> to vector<1x64xf32>
    %214 = vector.broadcast %213 : vector<1x64xf32> to vector<16x64xf32>
    %215 = arith.mulf %214, %200 : vector<16x64xf32>
    %216 = arith.addf %199, %215 : vector<16x64xf32>
    %217 = vector.extract_strided_slice %112 {offsets = [0, 9], sizes = [16, 64], strides = [1, 1]} : vector<16x128xf32> to vector<16x64xf32>
    %218 = vector.extract_strided_slice %0 {offsets = [46, 0], sizes = [1, 64], strides = [1, 1]} : vector<88x64xf32> to vector<1x64xf32>
    %219 = vector.broadcast %218 : vector<1x64xf32> to vector<16x64xf32>
    %220 = arith.mulf %219, %217 : vector<16x64xf32>
    %221 = arith.addf %204, %220 : vector<16x64xf32>
    %222 = vector.extract_strided_slice %0 {offsets = [47, 0], sizes = [1, 64], strides = [1, 1]} : vector<88x64xf32> to vector<1x64xf32>
    %223 = vector.broadcast %222 : vector<1x64xf32> to vector<16x64xf32>
    %224 = arith.mulf %223, %217 : vector<16x64xf32>
    %225 = arith.addf %208, %224 : vector<16x64xf32>
    %226 = vector.extract_strided_slice %0 {offsets = [48, 0], sizes = [1, 64], strides = [1, 1]} : vector<88x64xf32> to vector<1x64xf32>
    %227 = vector.broadcast %226 : vector<1x64xf32> to vector<16x64xf32>
    %228 = arith.mulf %227, %217 : vector<16x64xf32>
    %229 = arith.addf %212, %228 : vector<16x64xf32>
    %230 = vector.extract_strided_slice %0 {offsets = [49, 0], sizes = [1, 64], strides = [1, 1]} : vector<88x64xf32> to vector<1x64xf32>
    %231 = vector.broadcast %230 : vector<1x64xf32> to vector<16x64xf32>
    %232 = arith.mulf %231, %217 : vector<16x64xf32>
    %233 = arith.addf %216, %232 : vector<16x64xf32>
    %234 = vector.extract_strided_slice %112 {offsets = [0, 10], sizes = [16, 64], strides = [1, 1]} : vector<16x128xf32> to vector<16x64xf32>
    %235 = vector.extract_strided_slice %0 {offsets = [50, 0], sizes = [1, 64], strides = [1, 1]} : vector<88x64xf32> to vector<1x64xf32>
    %236 = vector.broadcast %235 : vector<1x64xf32> to vector<16x64xf32>
    %237 = arith.mulf %236, %234 : vector<16x64xf32>
    %238 = arith.addf %221, %237 : vector<16x64xf32>
    %239 = vector.extract_strided_slice %0 {offsets = [51, 0], sizes = [1, 64], strides = [1, 1]} : vector<88x64xf32> to vector<1x64xf32>
    %240 = vector.broadcast %239 : vector<1x64xf32> to vector<16x64xf32>
    %241 = arith.mulf %240, %234 : vector<16x64xf32>
    %242 = arith.addf %225, %241 : vector<16x64xf32>
    %243 = vector.extract_strided_slice %0 {offsets = [52, 0], sizes = [1, 64], strides = [1, 1]} : vector<88x64xf32> to vector<1x64xf32>
    %244 = vector.broadcast %243 : vector<1x64xf32> to vector<16x64xf32>
    %245 = arith.mulf %244, %234 : vector<16x64xf32>
    %246 = arith.addf %229, %245 : vector<16x64xf32>
    %247 = vector.extract_strided_slice %0 {offsets = [53, 0], sizes = [1, 64], strides = [1, 1]} : vector<88x64xf32> to vector<1x64xf32>
    %248 = vector.broadcast %247 : vector<1x64xf32> to vector<16x64xf32>
    %249 = arith.mulf %248, %234 : vector<16x64xf32>
    %250 = arith.addf %233, %249 : vector<16x64xf32>
    %251 = vector.extract_strided_slice %112 {offsets = [0, 11], sizes = [16, 64], strides = [1, 1]} : vector<16x128xf32> to vector<16x64xf32>
    %252 = vector.extract_strided_slice %0 {offsets = [54, 0], sizes = [1, 64], strides = [1, 1]} : vector<88x64xf32> to vector<1x64xf32>
    %253 = vector.broadcast %252 : vector<1x64xf32> to vector<16x64xf32>
    %254 = arith.mulf %253, %251 : vector<16x64xf32>
    %255 = arith.addf %238, %254 : vector<16x64xf32>
    %256 = vector.extract_strided_slice %0 {offsets = [55, 0], sizes = [1, 64], strides = [1, 1]} : vector<88x64xf32> to vector<1x64xf32>
    %257 = vector.broadcast %256 : vector<1x64xf32> to vector<16x64xf32>
    %258 = arith.mulf %257, %251 : vector<16x64xf32>
    %259 = arith.addf %242, %258 : vector<16x64xf32>
    %260 = vector.extract_strided_slice %0 {offsets = [56, 0], sizes = [1, 64], strides = [1, 1]} : vector<88x64xf32> to vector<1x64xf32>
    %261 = vector.broadcast %260 : vector<1x64xf32> to vector<16x64xf32>
    %262 = arith.mulf %261, %251 : vector<16x64xf32>
    %263 = arith.addf %246, %262 : vector<16x64xf32>
    %264 = vector.extract_strided_slice %0 {offsets = [57, 0], sizes = [1, 64], strides = [1, 1]} : vector<88x64xf32> to vector<1x64xf32>
    %265 = vector.broadcast %264 : vector<1x64xf32> to vector<16x64xf32>
    %266 = arith.mulf %265, %251 : vector<16x64xf32>
    %267 = arith.addf %250, %266 : vector<16x64xf32>
    %268 = vector.extract_strided_slice %112 {offsets = [0, 12], sizes = [16, 64], strides = [1, 1]} : vector<16x128xf32> to vector<16x64xf32>
    %269 = vector.extract_strided_slice %0 {offsets = [58, 0], sizes = [1, 64], strides = [1, 1]} : vector<88x64xf32> to vector<1x64xf32>
    %270 = vector.broadcast %269 : vector<1x64xf32> to vector<16x64xf32>
    %271 = arith.mulf %270, %268 : vector<16x64xf32>
    %272 = arith.addf %259, %271 : vector<16x64xf32>
    %273 = vector.extract_strided_slice %0 {offsets = [59, 0], sizes = [1, 64], strides = [1, 1]} : vector<88x64xf32> to vector<1x64xf32>
    %274 = vector.broadcast %273 : vector<1x64xf32> to vector<16x64xf32>
    %275 = arith.mulf %274, %268 : vector<16x64xf32>
    %276 = arith.addf %267, %275 : vector<16x64xf32>
    %277 = vector.extract_strided_slice %112 {offsets = [0, 13], sizes = [16, 64], strides = [1, 1]} : vector<16x128xf32> to vector<16x64xf32>
    %278 = vector.extract_strided_slice %0 {offsets = [60, 0], sizes = [1, 64], strides = [1, 1]} : vector<88x64xf32> to vector<1x64xf32>
    %279 = vector.broadcast %278 : vector<1x64xf32> to vector<16x64xf32>
    %280 = arith.mulf %279, %277 : vector<16x64xf32>
    %281 = arith.addf %272, %280 : vector<16x64xf32>
    %282 = vector.extract_strided_slice %0 {offsets = [61, 0], sizes = [1, 64], strides = [1, 1]} : vector<88x64xf32> to vector<1x64xf32>
    %283 = vector.broadcast %282 : vector<1x64xf32> to vector<16x64xf32>
    %284 = arith.mulf %283, %277 : vector<16x64xf32>
    %285 = arith.addf %276, %284 : vector<16x64xf32>
    %286 = vector.extract_strided_slice %112 {offsets = [0, 14], sizes = [16, 64], strides = [1, 1]} : vector<16x128xf32> to vector<16x64xf32>
    %287 = vector.extract_strided_slice %0 {offsets = [62, 0], sizes = [1, 64], strides = [1, 1]} : vector<88x64xf32> to vector<1x64xf32>
    %288 = vector.broadcast %287 : vector<1x64xf32> to vector<16x64xf32>
    %289 = arith.mulf %288, %286 : vector<16x64xf32>
    %290 = arith.addf %281, %289 : vector<16x64xf32>
    %291 = vector.extract_strided_slice %0 {offsets = [63, 0], sizes = [1, 64], strides = [1, 1]} : vector<88x64xf32> to vector<1x64xf32>
    %292 = vector.broadcast %291 : vector<1x64xf32> to vector<16x64xf32>
    %293 = arith.mulf %292, %286 : vector<16x64xf32>
    %294 = arith.addf %285, %293 : vector<16x64xf32>
    %295 = vector.extract_strided_slice %112 {offsets = [0, 15], sizes = [16, 64], strides = [1, 1]} : vector<16x128xf32> to vector<16x64xf32>
    %296 = vector.extract_strided_slice %0 {offsets = [64, 0], sizes = [1, 64], strides = [1, 1]} : vector<88x64xf32> to vector<1x64xf32>
    %297 = vector.broadcast %296 : vector<1x64xf32> to vector<16x64xf32>
    %298 = arith.mulf %297, %295 : vector<16x64xf32>
    %299 = arith.addf %290, %298 : vector<16x64xf32>
    %300 = vector.extract_strided_slice %0 {offsets = [65, 0], sizes = [1, 64], strides = [1, 1]} : vector<88x64xf32> to vector<1x64xf32>
    %301 = vector.broadcast %300 : vector<1x64xf32> to vector<16x64xf32>
    %302 = arith.mulf %301, %295 : vector<16x64xf32>
    %303 = arith.addf %294, %302 : vector<16x64xf32>
    %c0_11 = arith.constant 0 : index
    %c2 = arith.constant 2 : index
    %c0_12 = arith.constant 0 : index
    %304 = vector.load %arg1[%c0_11, %c2, %c0_12] : memref<1x18x128xf32, #tpu.memory_space<vmem>>, vector<1x16x128xf32>
    %305 = vector.shape_cast %304 : vector<1x16x128xf32> to vector<16x128xf32>
    %306 = vector.extract_strided_slice %305 {offsets = [0, 1], sizes = [16, 64], strides = [1, 1]} : vector<16x128xf32> to vector<16x64xf32>
    %307 = vector.extract_strided_slice %0 {offsets = [66, 0], sizes = [1, 64], strides = [1, 1]} : vector<88x64xf32> to vector<1x64xf32>
    %308 = vector.broadcast %307 : vector<1x64xf32> to vector<16x64xf32>
    %309 = arith.mulf %308, %306 : vector<16x64xf32>
    %310 = arith.addf %263, %309 : vector<16x64xf32>
    %311 = vector.extract_strided_slice %305 {offsets = [0, 2], sizes = [16, 64], strides = [1, 1]} : vector<16x128xf32> to vector<16x64xf32>
    %312 = vector.extract_strided_slice %0 {offsets = [67, 0], sizes = [1, 64], strides = [1, 1]} : vector<88x64xf32> to vector<1x64xf32>
    %313 = vector.broadcast %312 : vector<1x64xf32> to vector<16x64xf32>
    %314 = arith.mulf %313, %311 : vector<16x64xf32>
    %315 = arith.addf %310, %314 : vector<16x64xf32>
    %316 = vector.extract_strided_slice %305 {offsets = [0, 3], sizes = [16, 64], strides = [1, 1]} : vector<16x128xf32> to vector<16x64xf32>
    %317 = vector.extract_strided_slice %0 {offsets = [68, 0], sizes = [1, 64], strides = [1, 1]} : vector<88x64xf32> to vector<1x64xf32>
    %318 = vector.broadcast %317 : vector<1x64xf32> to vector<16x64xf32>
    %319 = arith.mulf %318, %316 : vector<16x64xf32>
    %320 = arith.addf %315, %319 : vector<16x64xf32>
    %321 = vector.extract_strided_slice %305 {offsets = [0, 4], sizes = [16, 64], strides = [1, 1]} : vector<16x128xf32> to vector<16x64xf32>
    %322 = vector.extract_strided_slice %0 {offsets = [69, 0], sizes = [1, 64], strides = [1, 1]} : vector<88x64xf32> to vector<1x64xf32>
    %323 = vector.broadcast %322 : vector<1x64xf32> to vector<16x64xf32>
    %324 = arith.mulf %323, %321 : vector<16x64xf32>
    %325 = arith.addf %320, %324 : vector<16x64xf32>
    %326 = vector.extract_strided_slice %305 {offsets = [0, 5], sizes = [16, 64], strides = [1, 1]} : vector<16x128xf32> to vector<16x64xf32>
    %327 = vector.extract_strided_slice %0 {offsets = [70, 0], sizes = [1, 64], strides = [1, 1]} : vector<88x64xf32> to vector<1x64xf32>
    %328 = vector.broadcast %327 : vector<1x64xf32> to vector<16x64xf32>
    %329 = arith.mulf %328, %326 : vector<16x64xf32>
    %330 = arith.addf %325, %329 : vector<16x64xf32>
    %331 = vector.extract_strided_slice %0 {offsets = [71, 0], sizes = [1, 64], strides = [1, 1]} : vector<88x64xf32> to vector<1x64xf32>
    %332 = vector.broadcast %331 : vector<1x64xf32> to vector<16x64xf32>
    %333 = arith.mulf %332, %326 : vector<16x64xf32>
    %334 = arith.addf %303, %333 : vector<16x64xf32>
    %335 = vector.extract_strided_slice %305 {offsets = [0, 6], sizes = [16, 64], strides = [1, 1]} : vector<16x128xf32> to vector<16x64xf32>
    %336 = vector.extract_strided_slice %0 {offsets = [72, 0], sizes = [1, 64], strides = [1, 1]} : vector<88x64xf32> to vector<1x64xf32>
    %337 = vector.broadcast %336 : vector<1x64xf32> to vector<16x64xf32>
    %338 = arith.mulf %337, %335 : vector<16x64xf32>
    %339 = arith.addf %330, %338 : vector<16x64xf32>
    %340 = vector.extract_strided_slice %0 {offsets = [73, 0], sizes = [1, 64], strides = [1, 1]} : vector<88x64xf32> to vector<1x64xf32>
    %341 = vector.broadcast %340 : vector<1x64xf32> to vector<16x64xf32>
    %342 = arith.mulf %341, %335 : vector<16x64xf32>
    %343 = arith.addf %334, %342 : vector<16x64xf32>
    %344 = vector.extract_strided_slice %305 {offsets = [0, 7], sizes = [16, 64], strides = [1, 1]} : vector<16x128xf32> to vector<16x64xf32>
    %345 = vector.extract_strided_slice %0 {offsets = [74, 0], sizes = [1, 64], strides = [1, 1]} : vector<88x64xf32> to vector<1x64xf32>
    %346 = vector.broadcast %345 : vector<1x64xf32> to vector<16x64xf32>
    %347 = arith.mulf %346, %344 : vector<16x64xf32>
    %348 = arith.addf %339, %347 : vector<16x64xf32>
    %349 = vector.extract_strided_slice %0 {offsets = [75, 0], sizes = [1, 64], strides = [1, 1]} : vector<88x64xf32> to vector<1x64xf32>
    %350 = vector.broadcast %349 : vector<1x64xf32> to vector<16x64xf32>
    %351 = arith.mulf %350, %344 : vector<16x64xf32>
    %352 = arith.addf %343, %351 : vector<16x64xf32>
    %353 = vector.extract_strided_slice %305 {offsets = [0, 8], sizes = [16, 64], strides = [1, 1]} : vector<16x128xf32> to vector<16x64xf32>
    %354 = vector.extract_strided_slice %0 {offsets = [76, 0], sizes = [1, 64], strides = [1, 1]} : vector<88x64xf32> to vector<1x64xf32>
    %355 = vector.broadcast %354 : vector<1x64xf32> to vector<16x64xf32>
    %356 = arith.mulf %355, %353 : vector<16x64xf32>
    %357 = arith.addf %348, %356 : vector<16x64xf32>
    %358 = vector.extract_strided_slice %0 {offsets = [77, 0], sizes = [1, 64], strides = [1, 1]} : vector<88x64xf32> to vector<1x64xf32>
    %359 = vector.broadcast %358 : vector<1x64xf32> to vector<16x64xf32>
    %360 = arith.mulf %359, %353 : vector<16x64xf32>
    %361 = arith.addf %352, %360 : vector<16x64xf32>
    %362 = vector.extract_strided_slice %305 {offsets = [0, 9], sizes = [16, 64], strides = [1, 1]} : vector<16x128xf32> to vector<16x64xf32>
    %363 = vector.extract_strided_slice %0 {offsets = [78, 0], sizes = [1, 64], strides = [1, 1]} : vector<88x64xf32> to vector<1x64xf32>
    %364 = vector.broadcast %363 : vector<1x64xf32> to vector<16x64xf32>
    %365 = arith.mulf %364, %362 : vector<16x64xf32>
    %366 = arith.addf %357, %365 : vector<16x64xf32>
    %367 = vector.extract_strided_slice %0 {offsets = [79, 0], sizes = [1, 64], strides = [1, 1]} : vector<88x64xf32> to vector<1x64xf32>
    %368 = vector.broadcast %367 : vector<1x64xf32> to vector<16x64xf32>
    %369 = arith.mulf %368, %362 : vector<16x64xf32>
    %370 = arith.addf %361, %369 : vector<16x64xf32>
    %371 = vector.extract_strided_slice %305 {offsets = [0, 10], sizes = [16, 64], strides = [1, 1]} : vector<16x128xf32> to vector<16x64xf32>
    %372 = vector.extract_strided_slice %0 {offsets = [80, 0], sizes = [1, 64], strides = [1, 1]} : vector<88x64xf32> to vector<1x64xf32>
    %373 = vector.broadcast %372 : vector<1x64xf32> to vector<16x64xf32>
    %374 = arith.mulf %373, %371 : vector<16x64xf32>
    %375 = arith.addf %366, %374 : vector<16x64xf32>
    %376 = vector.extract_strided_slice %0 {offsets = [81, 0], sizes = [1, 64], strides = [1, 1]} : vector<88x64xf32> to vector<1x64xf32>
    %377 = vector.broadcast %376 : vector<1x64xf32> to vector<16x64xf32>
    %378 = arith.mulf %377, %371 : vector<16x64xf32>
    %379 = arith.addf %370, %378 : vector<16x64xf32>
    %380 = vector.extract_strided_slice %305 {offsets = [0, 11], sizes = [16, 64], strides = [1, 1]} : vector<16x128xf32> to vector<16x64xf32>
    %381 = vector.extract_strided_slice %0 {offsets = [82, 0], sizes = [1, 64], strides = [1, 1]} : vector<88x64xf32> to vector<1x64xf32>
    %382 = vector.broadcast %381 : vector<1x64xf32> to vector<16x64xf32>
    %383 = arith.mulf %382, %380 : vector<16x64xf32>
    %384 = arith.addf %375, %383 : vector<16x64xf32>
    %385 = vector.extract_strided_slice %0 {offsets = [83, 0], sizes = [1, 64], strides = [1, 1]} : vector<88x64xf32> to vector<1x64xf32>
    %386 = vector.broadcast %385 : vector<1x64xf32> to vector<16x64xf32>
    %387 = arith.mulf %386, %380 : vector<16x64xf32>
    %388 = arith.addf %379, %387 : vector<16x64xf32>
    %389 = vector.extract_strided_slice %305 {offsets = [0, 12], sizes = [16, 64], strides = [1, 1]} : vector<16x128xf32> to vector<16x64xf32>
    %390 = vector.extract_strided_slice %0 {offsets = [84, 0], sizes = [1, 64], strides = [1, 1]} : vector<88x64xf32> to vector<1x64xf32>
    %391 = vector.broadcast %390 : vector<1x64xf32> to vector<16x64xf32>
    %392 = arith.mulf %391, %389 : vector<16x64xf32>
    %393 = arith.addf %388, %392 : vector<16x64xf32>
    %394 = vector.extract_strided_slice %305 {offsets = [0, 13], sizes = [16, 64], strides = [1, 1]} : vector<16x128xf32> to vector<16x64xf32>
    %395 = vector.extract_strided_slice %0 {offsets = [85, 0], sizes = [1, 64], strides = [1, 1]} : vector<88x64xf32> to vector<1x64xf32>
    %396 = vector.broadcast %395 : vector<1x64xf32> to vector<16x64xf32>
    %397 = arith.mulf %396, %394 : vector<16x64xf32>
    %398 = arith.addf %393, %397 : vector<16x64xf32>
    %399 = vector.extract_strided_slice %305 {offsets = [0, 14], sizes = [16, 64], strides = [1, 1]} : vector<16x128xf32> to vector<16x64xf32>
    %400 = vector.extract_strided_slice %0 {offsets = [86, 0], sizes = [1, 64], strides = [1, 1]} : vector<88x64xf32> to vector<1x64xf32>
    %401 = vector.broadcast %400 : vector<1x64xf32> to vector<16x64xf32>
    %402 = arith.mulf %401, %399 : vector<16x64xf32>
    %403 = arith.addf %398, %402 : vector<16x64xf32>
    %404 = vector.extract_strided_slice %305 {offsets = [0, 15], sizes = [16, 64], strides = [1, 1]} : vector<16x128xf32> to vector<16x64xf32>
    %405 = vector.extract_strided_slice %0 {offsets = [87, 0], sizes = [1, 64], strides = [1, 1]} : vector<88x64xf32> to vector<1x64xf32>
    %406 = vector.broadcast %405 : vector<1x64xf32> to vector<16x64xf32>
    %407 = arith.mulf %406, %404 : vector<16x64xf32>
    %408 = arith.addf %403, %407 : vector<16x64xf32>
    %409 = tpu.concatenate %255, %299, %384, %408 in 1 : vector<16x64xf32>, vector<16x64xf32>, vector<16x64xf32>, vector<16x64xf32> -> vector<16x256xf32>
    %410 = vector.broadcast %1 : vector<1x256xf32> to vector<16x256xf32>
    %411 = arith.addf %409, %410 : vector<16x256xf32>
    %c0_13 = arith.constant 0 : index
    %c0_14 = arith.constant 0 : index
    %c0_15 = arith.constant 0 : index
    %412 = vector.load %arg4[%c0_13, %c0_14, %c0_15] : memref<1x16x256xf32, #tpu.memory_space<vmem>>, vector<1x16x256xf32>
    %413 = vector.shape_cast %412 : vector<1x16x256xf32> to vector<16x256xf32>
    %414 = vector.shape_cast %411 : vector<16x256xf32> to vector<1x16x256xf32>
    tpu.vector_store %arg4[%c0_13, %c0_14, %c0_15], %414 {strides = array<i32>} : memref<1x16x256xf32, #tpu.memory_space<vmem>>, vector<1x16x256xf32>,
    return
  }
  func.func @transform_0(%arg0: i32) -> (i32, i32, i32) {
    %c0_i32 = arith.constant 0 : i32
    %c0_i32_0 = arith.constant 0 : i32
    %c0_i32_1 = arith.constant 0 : i32
    return %arg0, %c0_i32, %c0_i32_0 : i32, i32, i32
  }
  func.func @transform_1(%arg0: i32) -> (i32, i32) {
    %c0_i32 = arith.constant 0 : i32
    %c0_i32_0 = arith.constant 0 : i32
    %c0_i32_1 = arith.constant 0 : i32
    return %c0_i32, %c0_i32_0 : i32, i32
  }
  func.func @transform_2(%arg0: i32) -> (i32, i32) {
    %c0_i32 = arith.constant 0 : i32
    %c0_i32_0 = arith.constant 0 : i32
    %c0_i32_1 = arith.constant 0 : i32
    return %c0_i32, %c0_i32_0 : i32, i32
  }
  func.func @transform_3(%arg0: i32) -> (i32, i32, i32) {
    %c0_i32 = arith.constant 0 : i32
    %c0_i32_0 = arith.constant 0 : i32
    %c0_i32_1 = arith.constant 0 : i32
    return %arg0, %c0_i32, %c0_i32_0 : i32, i32, i32
  }
}

</mosaic_0001>

<bundles_post_ra>
// kernel: tile.18
= control target key start
LH: loop header
LB: loop body
LE: loop exit
PB: predicated region body
PF: predicated region fallthrough
CT: control target
= control target key end

     0   :  { %s64_s0 = inlined_call_operand.vmem [shape: f32[4], index: 0, kind: input, shape index: {}]   ;;  %s65_s1 = inlined_call_operand.vmem [shape: f32[64,4], index: 1, kind: output, shape index: {}]  }
   0x1   :  { %v4_v0 = vld [vmem:[%s64_s0] ss:$0 sm:$0xff] }
   0x2   :  { %5 = vst [vmem:[%s65_s1] sm:$0xff] %v4_v0  ;;  %20 = vst [vmem:[%s65_s1 + $0x8] sm:$0xff] %v4_v0 }
   0x3   :  { %21 = vst [vmem:[%s65_s1 + $0x10] sm:$0xff] %v4_v0  ;;  %22 = vst [vmem:[%s65_s1 + $0x18] sm:$0xff] %v4_v0 }
   0x4   :  { %23 = vst [vmem:[%s65_s1 + $0x20] sm:$0xff] %v4_v0  ;;  %24 = vst [vmem:[%s65_s1 + $0x28] sm:$0xff] %v4_v0 }
   0x5   :  { %25 = vst [vmem:[%s65_s1 + $0x30] sm:$0xff] %v4_v0  ;;  %26 = vst [vmem:[%s65_s1 + $0x38] sm:$0xff] %v4_v0 }

// kernel: tile.19
= control target key start
LH: loop header
LB: loop body
LE: loop exit
PB: predicated region body
PF: predicated region fallthrough
CT: control target
= control target key end

     0   :  { %vm5_vm0 = vcmask 1041409   ;;  %s428_s14 = smov 124   ;;  %s429_s21 = smov 116   ;;  %vm7_vm1 = vcmask 31744   ;;  %vm17_vm2 = vcmask 1048544   ;;  %vm27_vm3 = vcmask 1015744   ;;  %s699_s0 = inlined_call_operand.vmem [shape: f32[64,4], index: 0, kind: input, shape index: {}]   ;;  %s700_s1 = inlined_call_operand.vmem [shape: f32[1,256], index: 1, kind: output, shape index: {}]  }
   0x1   :  { %v334_v0 = vld [vmem:[%s699_s0 + $0x1f] sm:$0x1]   ;;  %v338_v3 = vld [vmem:[%s699_s0 + $0x1d] sm:$0x1]   ;;  %v336_v6 = vld [vmem:[%s699_s0 + $0x1e] sm:$0x1]  }
   0x2   :  { %v335_v1 = vld [vmem:[%s699_s0 + $0x3e] sm:$0x2]   ;;  %v339_v4 = vld [vmem:[%s699_s0 + $0x3c] sm:$0x2]   ;;  %v337_v7 = vld [vmem:[%s699_s0 + $0x3d] sm:$0x2]  }
   0x3   :  { %v14_v2 = vsel %vm5_vm0, %v335_v1, %v334_v0  ;;  %v34_v5 = vsel %vm5_vm0, %v339_v4, %v338_v3  ;;  %v340_v8 = vld [vmem:[%s699_s0 + $0x1c] sm:$0x1]   ;;  %v24_v9 = vsel %vm5_vm0, %v337_v7, %v336_v6  ;;  %v342_v12 = vld [vmem:[%s699_s0 + $0x1b] sm:$0x1]   ;;  %v344_v14 = vld [vmem:[%s699_s0 + $0x1a] sm:$0x1]  }
   0x4   :  { %15 = vrot.lane.b32.xlu0 %v14_v2, %s428_s14  ;;  %35 = vrot.lane.b32.xlu1 %v34_v5, %s429_s21  ;;  %v341_v10 = vld [vmem:[%s699_s0 + $0x3b] sm:$0x2]   ;;  %v343_v13 = vld [vmem:[%s699_s0 + $0x3a] sm:$0x2]   ;;  %s430_s3 = smov 120   ;;  %s431_s4 = smov 112  }
   0x5   :  { %v44_v11 = vsel %vm5_vm0, %v341_v10, %v340_v8  ;;  %v345_v15 = vld [vmem:[%s699_s0 + $0x39] sm:$0x2]   ;;  %v54_v16 = vsel %vm5_vm0, %v343_v13, %v342_v12  ;;  %v346_v18 = vld [vmem:[%s699_s0 + $0x19] sm:$0x1]   ;;  %v348_v20 = vld [vmem:[%s699_s0 + $0x18] sm:$0x1]  }
   0x6   :  { %v64_v17 = vsel %vm5_vm0, %v345_v15, %v344_v14  ;;  %v347_v19 = vld [vmem:[%s699_s0 + $0x38] sm:$0x2]   ;;  %v349_v21 = vld [vmem:[%s699_s0 + $0x37] sm:$0x2]   ;;  %s432_s13 = smov 108   ;;  %s433_s14 = smov 104  }
   0x7   :  { %v74_v22 = vsel %vm5_vm0, %v347_v19, %v346_v18  ;;  %v84_v23 = vsel %vm5_vm0, %v349_v21, %v348_v20  ;;  %v350_v24 = vld [vmem:[%s699_s0 + $0x17] sm:$0x1]   ;;  %v352_v26 = vld [vmem:[%s699_s0 + $0x16] sm:$0x1]   ;;  %s434_s23 = smov 100   ;;  %s435_s24 = smov 96  }
   0x8   :  { %25 = vrot.lane.b32.xlu0 %v24_v9, %s430_s3  ;;  %45 = vrot.lane.b32.xlu1 %v44_v11, %s431_s4  ;;  %v351_v25 = vld [vmem:[%s699_s0 + $0x36] sm:$0x2]   ;;  %v353_v27 = vld [vmem:[%s699_s0 + $0x35] sm:$0x2]   ;;  %s436_s4 = smov 92   ;;  %s437_s5 = smov 88  }
   0x9   :  { %v94_v28 = vsel %vm5_vm0, %v351_v25, %v350_v24  ;;  %v104_v29 = vsel %vm5_vm0, %v353_v27, %v352_v26  ;;  %v354_v30 = vld [vmem:[%s699_s0 + $0x15] sm:$0x1]   ;;  %v356_v32 = vld [vmem:[%s699_s0 + $0x14] sm:$0x1]   ;;  %v358_v36 = vld [vmem:[%s699_s0 + $0x13] sm:$0x1]  }
   0xa   :  { %v355_v31 = vld [vmem:[%s699_s0 + $0x34] sm:$0x2]   ;;  %v357_v33 = vld [vmem:[%s699_s0 + $0x33] sm:$0x2]   ;;  %v359_v37 = vld [vmem:[%s699_s0 + $0x32] sm:$0x2]  }
   0xb   :  { %v114_v34 = vsel %vm5_vm0, %v355_v31, %v354_v30  ;;  %v124_v35 = vsel %vm5_vm0, %v357_v33, %v356_v32  ;;  %v360_v38 = vld [vmem:[%s699_s0 + $0x12] sm:$0x1]   ;;  %s439_s15 = smov 80   ;;  %v134_v40 = vsel %vm5_vm0, %v359_v37, %v358_v36  ;;  %v362_v42 = vld [vmem:[%s699_s0 + $0x11] sm:$0x1]   ;;  %s441_s29 = smov 72  }
   0xc   :  { %55 = vrot.lane.b32.xlu0 %v54_v16, %s432_s13  ;;  %65 = vrot.lane.b32.xlu1 %v64_v17, %s433_s14  ;;  %v361_v39 = vld [vmem:[%s699_s0 + $0x31] sm:$0x2]   ;;  %s438_s14 = smov 84   ;;  %v363_v43 = vld [vmem:[%s699_s0 + $0x30] sm:$0x2]   ;;  %s442_s9 = smov 68  }
   0xd   :  { %v144_v41 = vsel %vm5_vm0, %v361_v39, %v360_v38  ;;  %v364_v44 = vld [vmem:[%s699_s0 + $0x10] sm:$0x1]   ;;  %v2_v46 = vld [vmem:[%s699_s0] sm:$0x1]   ;;  %v154_v48 = vsel %vm5_vm0, %v363_v43, %v362_v42  ;;  %v366_v51 = vld [vmem:[%s699_s0 + $0xf] sm:$0x1]  }
   0xe   :  { %v365_v45 = vld [vmem:[%s699_s0 + $0x2f] sm:$0x2]   ;;  %v333_v47 = vld [vmem:[%s699_s0 + $0x1f] sm:$0x2]   ;;  %v367_v52 = vld [vmem:[%s699_s0 + $0x2e] sm:$0x2]  }
   0xf   :  { %v6_v49 = vsel %vm5_vm0, %v333_v47, %v2_v46  ;;  %v164_v50 = vsel %vm5_vm0, %v365_v45, %v364_v44  ;;  %v368_v53 = vld [vmem:[%s699_s0 + $0xe] sm:$0x1]   ;;  %s443_s10 = smov 64   ;;  %v174_v55 = vsel %vm5_vm0, %v367_v52, %v366_v51  ;;  %v370_v57 = vld [vmem:[%s699_s0 + $0xd] sm:$0x1]   ;;  %s444_s19 = smov 60  }
  0x10   :  { %75 = vrot.lane.b32.xlu0 %v74_v22, %s434_s23  ;;  %85 = vrot.lane.b32.xlu1 %v84_v23, %s435_s24  ;;  %s440_s24 = smov 76   ;;  %8 = vst.msk [vmem:[#allocation0] ss:$8 sm:$0x3] %vm7_vm1, %v6_v49   ;;  %v369_v54 = vld [vmem:[%s699_s0 + $0x2d] sm:$0x2]  }
  0x11   :  { %v184_v56 = vsel %vm5_vm0, %v369_v54, %v368_v53  ;;  %v371_v58 = vld [vmem:[%s699_s0 + $0x2c] sm:$0x2]   ;;  %v372_v59 = vld [vmem:[%s699_s0 + $0xc] sm:$0x1]   ;;  %s445_s20 = smov 56   ;;  %s447_s30 = smov 48  }
  0x12   :  { %v373_v60 = vld [vmem:[%s699_s0 + $0x2b] sm:$0x2]   ;;  %v194_v61 = vsel %vm5_vm0, %v371_v58, %v370_v57  ;;  %v374_v63 = vld [vmem:[%s699_s0 + $0xb] sm:$0x1]   ;;  %v376_v1 = vld [vmem:[%s699_s0 + $0xa] sm:$0x1]  }
  0x13   :  { %v204_v62 = vsel %vm5_vm0, %v373_v60, %v372_v59  ;;  %v375_v0 = vld [vmem:[%s699_s0 + $0x2a] sm:$0x2]   ;;  %v377_v2 = vld [vmem:[%s699_s0 + $0x29] sm:$0x2]   ;;  %v378_v5 = vld [vmem:[%s699_s0 + $0x9] sm:$0x1]  }
  0x14   :  { %95 = vrot.lane.b32.xlu0 %v94_v28, %s436_s4  ;;  %105 = vrot.lane.b32.xlu1 %v104_v29, %s437_s5  ;;  %v214_v3 = vsel %vm5_vm0, %v375_v0, %v374_v63  ;;  %v224_v4 = vsel %vm5_vm0, %v377_v2, %v376_v1  ;;  %v379_v6 = vld [vmem:[%s699_s0 + $0x28] sm:$0x2]   ;;  %v380_v7 = vld [vmem:[%s699_s0 + $0x8] sm:$0x1]   ;;  %s449_s11 = smov 40   ;;  %s451_s21 = smov 32  }
  0x15   :  { %v381_v8 = vld [vmem:[%s699_s0 + $0x27] sm:$0x2]   ;;  %v234_v9 = vsel %vm5_vm0, %v379_v6, %v378_v5  ;;  %v382_v11 = vld [vmem:[%s699_s0 + $0x7] sm:$0x1]   ;;  %v384_v13 = vld [vmem:[%s699_s0 + $0x6] sm:$0x1]  }
  0x16   :  { %v244_v10 = vsel %vm5_vm0, %v381_v8, %v380_v7  ;;  %v383_v12 = vld [vmem:[%s699_s0 + $0x26] sm:$0x2]   ;;  %v385_v14 = vld [vmem:[%s699_s0 + $0x25] sm:$0x2]   ;;  %v386_v17 = vld [vmem:[%s699_s0 + $0x5] sm:$0x1]  }
  0x17   :  { %v254_v15 = vsel %vm5_vm0, %v383_v12, %v382_v11  ;;  %v264_v16 = vsel %vm5_vm0, %v385_v14, %v384_v13  ;;  %v387_v18 = vld [vmem:[%s699_s0 + $0x24] sm:$0x2]   ;;  %v388_v19 = vld [vmem:[%s699_s0 + $0x4] sm:$0x1]   ;;  %s453_s2 = smov 24   ;;  %s455_s12 = smov 16  }
  0x18   :  { %115 = vrot.lane.b32.xlu0 %v114_v34, %s438_s14  ;;  %125 = vrot.lane.b32.xlu1 %v124_v35, %s439_s15  ;;  %v389_v20 = vld [vmem:[%s699_s0 + $0x23] sm:$0x2]   ;;  %v274_v21 = vsel %vm5_vm0, %v387_v18, %v386_v17  ;;  %v390_v23 = vld [vmem:[%s699_s0 + $0x3] sm:$0x1]   ;;  %s457_s17 = smov 8   ;;  %s458_s18 = smov 4  }
  0x19   :  { %v284_v22 = vsel %vm5_vm0, %v389_v20, %v388_v19  ;;  %v391_v24 = vld [vmem:[%s699_s0 + $0x22] sm:$0x2]   ;;  %v392_v25 = vld [vmem:[%s699_s0 + $0x2] sm:$0x1]   ;;  %v394_v29 = vld [vmem:[%s699_s0 + $0x1] sm:$0x1]  }
  0x1a   :  { %v393_v26 = vld [vmem:[%s699_s0 + $0x21] sm:$0x2]   ;;  %v294_v27 = vsel %vm5_vm0, %v391_v24, %v390_v23  ;;  %v395_v30 = vld [vmem:[%s699_s0 + $0x20] sm:$0x2]   ;;  %s456_s0 = smov 12   ;;  %vm37_vm4 = vcmask 982944  }
  0x1b   :  { %v304_v28 = vsel %vm5_vm0, %v393_v26, %v392_v25  ;;  %v314_v31 = vsel %vm5_vm0, %v395_v30, %v394_v29  ;;  %vm47_vm5 = vcmask 950144   ;;  %vm57_vm6 = vcmask 917344  }
  0x1c   :  { %135 = vrot.lane.b32.xlu0 %v134_v40, %s440_s24  ;;  %145 = vrot.lane.b32.xlu1 %v144_v41, %s441_s29  ;;  %s446_s29 = smov 52   ;;  %vm67_vm7 = vcmask 884544   ;;  %vm77_vm8 = vcmask 851744   ;;  %vm87_vm9 = vcmask 818944   ;;  %vm97_vm10 = vcmask 786144  }
  0x1d   :  { %vm107_vm11 = vcmask 753344   ;;  %vm117_vm12 = vcmask 720544   ;;  %vm127_vm13 = vcmask 687744   ;;  %vm137_vm14 = vcmask 654944  }
  0x1e   :  { %vm147_vm15 = vcmask 622144   ;;  %vm157_vm0 = vcmask 589344   ;;  %vm167_vm1 = vcmask 556544  }
  0x20   :  { %155 = vrot.lane.b32.xlu0 %v154_v48, %s442_s9  ;;  %165 = vrot.lane.b32.xlu1 %v164_v50, %s443_s10  ;;  %s448_s10 = smov 44  }
  0x24   :  { %175 = vrot.lane.b32.xlu0 %v174_v55, %s444_s19  ;;  %185 = vrot.lane.b32.xlu1 %v184_v56, %s445_s20  ;;  %s450_s20 = smov 36  }
  0x28   :  { %195 = vrot.lane.b32.xlu0 %v194_v61, %s446_s29  ;;  %205 = vrot.lane.b32.xlu1 %v204_v62, %s447_s30  ;;  %s452_s30 = smov 28  }
  0x2c   :  { %215 = vrot.lane.b32.xlu0 %v214_v3, %s448_s10  ;;  %225 = vrot.lane.b32.xlu1 %v224_v4, %s449_s11  ;;  %s454_s11 = smov 20  }
  0x30   :  { %235 = vrot.lane.b32.xlu0 %v234_v9, %s450_s20  ;;  %245 = vrot.lane.b32.xlu1 %v244_v10, %s451_s21 }
  0x34   :  { %255 = vrot.lane.b32.xlu0 %v254_v15, %s452_s30  ;;  %265 = vrot.lane.b32.xlu1 %v264_v16, %s453_s2 }
  0x38   :  { %275 = vrot.lane.b32.xlu0 %v274_v21, %s454_s11  ;;  %285 = vrot.lane.b32.xlu1 %v284_v22, %s455_s12 }
  0x3c   :  { %295 = vrot.lane.b32.xlu0 %v294_v27, %s456_s0  ;;  %305 = vrot.lane.b32.xlu1 %v304_v28, %s457_s17 }
  0x40   :  { %315 = vrot.lane.b32.xlu0 %v314_v31, %s458_s18 }
  0x76   :  { %v16_v32 = vpop.permute.xlu0 %15   ;;  %v36_v33 = vpop.permute.xlu1 %35  }
  0x77   :  { %18 = vst.msk [vmem:[#allocation0] ss:$8 sm:$0x3] %vm17_vm2, %v16_v32   ;;  %vm177_vm2 = vcmask 523744  }
  0x7a   :  { %v26_v34 = vpop.permute.xlu0 %25   ;;  %v46_v35 = vpop.permute.xlu1 %45  }
  0x7b   :  { %28 = vst.msk [vmem:[#allocation0] ss:$8 sm:$0x3] %vm27_vm3, %v26_v34   ;;  %vm187_vm3 = vcmask 490944  }
  0x7c   :  { %38 = vst.msk [vmem:[#allocation0] ss:$8 sm:$0x3] %vm37_vm4, %v36_v33   ;;  %vm197_vm4 = vcmask 458144  }
  0x7d   :  { %48 = vst.msk [vmem:[#allocation0] ss:$8 sm:$0x3] %vm47_vm5, %v46_v35   ;;  %vm207_vm5 = vcmask 425344  }
  0x7e   :  { %v56_v36 = vpop.permute.xlu0 %55   ;;  %v66_v37 = vpop.permute.xlu1 %65  }
  0x7f   :  { %58 = vst.msk [vmem:[#allocation0] ss:$8 sm:$0x3] %vm57_vm6, %v56_v36   ;;  %vm217_vm6 = vcmask 392544  }
  0x80   :  { %68 = vst.msk [vmem:[#allocation0] ss:$8 sm:$0x3] %vm67_vm7, %v66_v37   ;;  %vm227_vm7 = vcmask 359744  }
  0x82   :  { %v76_v38 = vpop.permute.xlu0 %75   ;;  %v86_v39 = vpop.permute.xlu1 %85  }
  0x83   :  { %78 = vst.msk [vmem:[#allocation0] ss:$8 sm:$0x3] %vm77_vm8, %v76_v38   ;;  %vm237_vm8 = vcmask 326944  }
  0x84   :  { %88 = vst.msk [vmem:[#allocation0] ss:$8 sm:$0x3] %vm87_vm9, %v86_v39   ;;  %vm247_vm9 = vcmask 294144  }
  0x86   :  { %v96_v40 = vpop.permute.xlu0 %95   ;;  %v106_v41 = vpop.permute.xlu1 %105  }
  0x87   :  { %98 = vst.msk [vmem:[#allocation0] ss:$8 sm:$0x3] %vm97_vm10, %v96_v40   ;;  %vm257_vm10 = vcmask 261344  }
  0x88   :  { %108 = vst.msk [vmem:[#allocation0] ss:$8 sm:$0x3] %vm107_vm11, %v106_v41   ;;  %vm267_vm11 = vcmask 228544  }
  0x8a   :  { %v116_v42 = vpop.permute.xlu0 %115   ;;  %v126_v43 = vpop.permute.xlu1 %125  }
  0x8b   :  { %118 = vst.msk [vmem:[#allocation0] ss:$8 sm:$0x3] %vm117_vm12, %v116_v42   ;;  %vm277_vm12 = vcmask 195744  }
  0x8c   :  { %128 = vst.msk [vmem:[#allocation0] ss:$8 sm:$0x3] %vm127_vm13, %v126_v43   ;;  %vm287_vm13 = vcmask 162944  }
  0x8e   :  { %v136_v44 = vpop.permute.xlu0 %135   ;;  %v146_v45 = vpop.permute.xlu1 %145  }
  0x8f   :  { %138 = vst.msk [vmem:[#allocation0] ss:$8 sm:$0x3] %vm137_vm14, %v136_v44   ;;  %vm297_vm14 = vcmask 130144  }
  0x90   :  { %148 = vst.msk [vmem:[#allocation0] ss:$8 sm:$0x3] %vm147_vm15, %v146_v45   ;;  %vm307_vm15 = vcmask 97344  }
  0x92   :  { %v156_v46 = vpop.permute.xlu0 %155   ;;  %v166_v47 = vpop.permute.xlu1 %165  }
  0x93   :  { %158 = vst.msk [vmem:[#allocation0] ss:$8 sm:$0x3] %vm157_vm0, %v156_v46   ;;  %vm317_vm0 = vcmask 64544  }
  0x94   :  { %168 = vst.msk [vmem:[#allocation0] ss:$8 sm:$0x3] %vm167_vm1, %v166_v47  }
  0x96   :  { %v176_v48 = vpop.permute.xlu0 %175   ;;  %v186_v49 = vpop.permute.xlu1 %185  }
  0x97   :  { %178 = vst.msk [vmem:[#allocation0] ss:$8 sm:$0x3] %vm177_vm2, %v176_v48  }
  0x98   :  { %188 = vst.msk [vmem:[#allocation0] ss:$8 sm:$0x3] %vm187_vm3, %v186_v49  }
  0x9a   :  { %v196_v50 = vpop.permute.xlu0 %195   ;;  %v206_v51 = vpop.permute.xlu1 %205  }
  0x9b   :  { %198 = vst.msk [vmem:[#allocation0] ss:$8 sm:$0x3] %vm197_vm4, %v196_v50  }
  0x9c   :  { %208 = vst.msk [vmem:[#allocation0] ss:$8 sm:$0x3] %vm207_vm5, %v206_v51  }
  0x9e   :  { %v216_v52 = vpop.permute.xlu0 %215   ;;  %v226_v53 = vpop.permute.xlu1 %225  }
  0x9f   :  { %218 = vst.msk [vmem:[#allocation0] ss:$8 sm:$0x3] %vm217_vm6, %v216_v52  }
  0xa0   :  { %228 = vst.msk [vmem:[#allocation0] ss:$8 sm:$0x3] %vm227_vm7, %v226_v53  }
  0xa2   :  { %v236_v54 = vpop.permute.xlu0 %235   ;;  %v246_v55 = vpop.permute.xlu1 %245  }
  0xa3   :  { %238 = vst.msk [vmem:[#allocation0] ss:$8 sm:$0x3] %vm237_vm8, %v236_v54  }
  0xa4   :  { %248 = vst.msk [vmem:[#allocation0] ss:$8 sm:$0x3] %vm247_vm9, %v246_v55  }
  0xa6   :  { %v256_v56 = vpop.permute.xlu0 %255   ;;  %v266_v57 = vpop.permute.xlu1 %265  }
  0xa7   :  { %258 = vst.msk [vmem:[#allocation0] ss:$8 sm:$0x3] %vm257_vm10, %v256_v56  }
  0xa8   :  { %268 = vst.msk [vmem:[#allocation0] ss:$8 sm:$0x3] %vm267_vm11, %v266_v57  }
  0xaa   :  { %v276_v58 = vpop.permute.xlu0 %275   ;;  %v286_v59 = vpop.permute.xlu1 %285  }
  0xab   :  { %278 = vst.msk [vmem:[#allocation0] ss:$8 sm:$0x3] %vm277_vm12, %v276_v58  }
  0xac   :  { %288 = vst.msk [vmem:[#allocation0] ss:$8 sm:$0x3] %vm287_vm13, %v286_v59  }
  0xae   :  { %v296_v60 = vpop.permute.xlu0 %295   ;;  %v306_v61 = vpop.permute.xlu1 %305  }
  0xaf   :  { %298 = vst.msk [vmem:[#allocation0] ss:$8 sm:$0x3] %vm297_vm14, %v296_v60  }
  0xb0   :  { %308 = vst.msk [vmem:[#allocation0] ss:$8 sm:$0x3] %vm307_vm15, %v306_v61  }
  0xb2   :  { %v316_v62 = vpop.permute.xlu0 %315  }
  0xb3   :  { %318 = vst.msk [vmem:[#allocation0] ss:$8 sm:$0x3] %vm317_vm0, %v316_v62  }
  0xba   :  { %v323_v63 = vld [vmem:[#allocation0] sm:$0x1]  ;;  %v328_v0 = vld [vmem:[#allocation0 + $0x8] sm:$0x1] }
  0xbb   :  { %326 = vst [vmem:[%s700_s1] sm:$0x1] %v323_v63  ;;  %396 = vst [vmem:[%s700_s1 + $0x1] sm:$0x1] %v328_v0 }

// kernel: upsample_forward.1
= control target key start
LH: loop header
LB: loop body
LE: loop exit
PB: predicated region body
PF: predicated region fallthrough
CT: control target
= control target key end

     0   :  { %s1344_s12 = smov 0   ;;  %s2164_s0 = inlined_call_operand.vmem [shape: f32[2,18,128], index: 0, kind: input, shape index: {}]   ;;  %s2165_s1 = inlined_call_operand.vmem [shape: f32[88,64], index: 1, kind: input, shape index: {}]   ;;  %s2166_s2 = inlined_call_operand.vmem [shape: f32[1,256], index: 2, kind: input, shape index: {}]   ;;  %s2167_s3 = inlined_call_operand.vmem [shape: f32[2,16,256], index: 3, kind: output, shape index: {}]  }
   0x1 LB: > { %s1264_s13 = sadd.s32 4294967295, %s1306_s12   ;;  %p1268_p0 = scmp.ge.s32.totalorder %s1306_s12, 1  ;;  %s1306_s12 = sphi %s1344_s12, %s13_s12  }
   0x2   : > { %p137_p1 = scmp.lt.s32.totalorder %s1306_s12, 3 }
   0x4   : > { %p138_p2 = pnand %p1268_p0, %p137_p1 }
   0x6   : > { %141 = sbr.rel (%p138_p2) target bundleno = 400 (0x190), region = 32 }
   0xb   : > { %p161_p3 = scmp.lt.s32.totalorder %s1264_s13, 1  ;;  %s1308_s18 = smov 126   ;;  %v185_v4 = vlaneseq  ;;  %v1484_v10 = vld [vmem:[%s2165_s1] sm:$0xff]  ;;  %v1548_v50 = vld [vmem:[%s2165_s1 + $0x8] sm:$0xff]  ;;  %vm1185_vm0 = vcmask 523264  }
   0xc   : > { %s1309_s19 = smov 127   ;;  %s1310_s20 = smov 125   ;;  %v1543_v47 = vld [vmem:[%s2165_s1 + $0x20] sm:$0xff] }
   0xd   : > { %s2239_s13 = smov (!%p161_p3, %s1264_s13), 1  ;;  %s1311_s21 = smov 124   ;;  %v1465_v7 = vshrl.u32 %v185_v4, 7 }
   0xe   : > { %s1275_s14 = smul.u32 24, %s2239_s13  ;;  %s1312_s22 = smov 123  }
   0xf   : > { %s1313_s23 = smov 122   ;;  %s1314_s24 = smov 121   ;;  %v1472_v8 = vsub.s32 1, %v1465_v7  ;;  %v1475_v9 = vsub.s32 0, %v1465_v7  ;;  %v1495_v17 = vsub.s32 2, %v1465_v7  ;;  %v1504_v24 = vsub.s32 3, %v1465_v7 }
  0x10   : > { %s1358_s17 = scalar_lea.vmem %s2164_s0, %s1275_s14  ;;  %s1315_s25 = smov 120   ;;  %v1513_v31 = vsub.s32 4, %v1465_v7  ;;  %v1522_v39 = vsub.s32 6, %v1465_v7  ;;  %v1565_v57 = vsub.s32 5, %v1465_v7 }
  0x11   : > { %v1361_v0 = vld [vmem:[%s1358_s17] sm:$0xff]  ;;  %v184_v1 = vld [vmem:[%s1358_s17 + $0x8] sm:$0xff]  ;;  %s1316_s26 = smov 119   ;;  %s1317_s27 = smov 118   ;;  %v204_v11 = vrot.slane %v1484_v10, %v1472_v8  ;;  %v188_v12 = vrot.slane %v1484_v10, %v1475_v9  ;;  %v218_v23 = vrot.slane %v1484_v10, %v1495_v17  ;;  %v232_v30 = vrot.slane %v1484_v10, %v1504_v24 }
  0x12   : > { %205 = vrot.lane.b32.xlu1 %v1361_v0, %s1308_s18  ;;  %191 = vrot.lane.b32.xlu0 %v1361_v0, %s1309_s19  ;;  %v1383_v2 = vld [vmem:[%s1358_s17 + $0x1] sm:$0xff]  ;;  %v1390_v3 = vld [vmem:[%s1358_s17 + $0x9] sm:$0xff]  ;;  %s1318_s28 = smov 117   ;;  %s1319_s29 = smov 116   ;;  %v246_v38 = vrot.slane %v1484_v10, %v1513_v31  ;;  %v268_v46 = vrot.slane %v1484_v10, %v1522_v39  ;;  %v570_v55 = vrot.slane %v1543_v47, %v1475_v9 }
  0x13   : > { %s1320_s30 = smov 115   ;;  %s1321_s4 = smov 114   ;;  %v1460_v5 = vld [vmem:[%s1358_s17 + $0xa] sm:$0xff]  ;;  %v1463_v6 = vld [vmem:[%s1358_s17 + $0x2] sm:$0xff]  ;;  %v290_v56 = vrot.slane %v1548_v50, %v1475_v9  ;;  %v578_v60 = vrot.slane %v1543_v47, %v1472_v8  ;;  %v616_v4 = vrot.slane %v1543_v47, %v1565_v57 }
  0x14   : > { %s1322_s5 = smov 113   ;;  %s1274_s6 = sshll.u32 %s2239_s13, 5 }
  0x15   : > { %s170_s9 = scalar_lea.vmem %s2167_s3, %s1274_s6 }
  0x16   : > { %207 = vrot.lane.b32.xlu1 %v184_v1, %s1308_s18  ;;  %193 = vrot.lane.b32.xlu0 %v184_v1, %s1309_s19 }
  0x1a   : > { %221 = vrot.lane.b32.xlu1 %v184_v1, %s1310_s20  ;;  %219 = vrot.lane.b32.xlu0 %v1361_v0, %s1310_s20 }
  0x1e   : > { %235 = vrot.lane.b32.xlu1 %v184_v1, %s1311_s21  ;;  %233 = vrot.lane.b32.xlu0 %v1361_v0, %s1311_s21 }
  0x22   : > { %249 = vrot.lane.b32.xlu1 %v184_v1, %s1312_s22  ;;  %247 = vrot.lane.b32.xlu0 %v1361_v0, %s1312_s22 }
  0x26   : > { %271 = vrot.lane.b32.xlu1 %v184_v1, %s1313_s23  ;;  %269 = vrot.lane.b32.xlu0 %v1361_v0, %s1313_s23 }
  0x2a   : > { %549 = vrot.lane.b32.xlu1 %v1383_v2, %s1312_s22  ;;  %291 = vrot.lane.b32.xlu0 %v1361_v0, %s1314_s24 }
  0x2e   : > { %587 = vrot.lane.b32.xlu1 %v1383_v2, %s1313_s23  ;;  %551 = vrot.lane.b32.xlu0 %v1390_v3, %s1312_s22 }
  0x32   : > { %293 = vrot.lane.b32.xlu1 %v184_v1, %s1314_s24  ;;  %589 = vrot.lane.b32.xlu0 %v1390_v3, %s1313_s23 }
  0x36   : > { %627 = vrot.lane.b32.xlu1 %v1390_v3, %s1314_s24  ;;  %625 = vrot.lane.b32.xlu0 %v1383_v2, %s1314_s24 }
  0x3a   : > { %315 = vrot.lane.b32.xlu1 %v184_v1, %s1315_s25  ;;  %313 = vrot.lane.b32.xlu0 %v1361_v0, %s1315_s25 }
  0x3e   : > { %665 = vrot.lane.b32.xlu1 %v1390_v3, %s1315_s25  ;;  %663 = vrot.lane.b32.xlu0 %v1383_v2, %s1315_s25 }
  0x42   : > { %337 = vrot.lane.b32.xlu1 %v184_v1, %s1316_s26  ;;  %335 = vrot.lane.b32.xlu0 %v1361_v0, %s1316_s26 }
  0x46   : > { %703 = vrot.lane.b32.xlu1 %v1390_v3, %s1316_s26  ;;  %701 = vrot.lane.b32.xlu0 %v1383_v2, %s1316_s26 }
  0x4a   : > { %359 = vrot.lane.b32.xlu1 %v184_v1, %s1317_s27  ;;  %357 = vrot.lane.b32.xlu0 %v1361_v0, %s1317_s27 }
  0x4e   : > { %741 = vrot.lane.b32.xlu1 %v1390_v3, %s1317_s27  ;;  %739 = vrot.lane.b32.xlu0 %v1383_v2, %s1317_s27 }
  0x52   : > { %381 = vrot.lane.b32.xlu1 %v184_v1, %s1318_s28  ;;  %379 = vrot.lane.b32.xlu0 %v1361_v0, %s1318_s28 }
  0x56   : > { %779 = vrot.lane.b32.xlu1 %v1390_v3, %s1318_s28  ;;  %777 = vrot.lane.b32.xlu0 %v1383_v2, %s1318_s28 }
  0x5a   : > { %403 = vrot.lane.b32.xlu1 %v184_v1, %s1319_s29  ;;  %401 = vrot.lane.b32.xlu0 %v1361_v0, %s1319_s29 }
  0x5e   : > { %817 = vrot.lane.b32.xlu1 %v1390_v3, %s1319_s29  ;;  %815 = vrot.lane.b32.xlu0 %v1383_v2, %s1319_s29 }
  0x62   : > { %417 = vrot.lane.b32.xlu1 %v184_v1, %s1320_s30  ;;  %415 = vrot.lane.b32.xlu0 %v1361_v0, %s1320_s30 }
  0x66   : > { %839 = vrot.lane.b32.xlu1 %v1390_v3, %s1320_s30  ;;  %837 = vrot.lane.b32.xlu0 %v1383_v2, %s1320_s30 }
  0x6a   : > { %431 = vrot.lane.b32.xlu1 %v184_v1, %s1321_s4  ;;  %429 = vrot.lane.b32.xlu0 %v1361_v0, %s1321_s4 }
  0x6e   : > { %861 = vrot.lane.b32.xlu1 %v1390_v3, %s1321_s4  ;;  %859 = vrot.lane.b32.xlu0 %v1383_v2, %s1321_s4 }
  0x72   : > { %445 = vrot.lane.b32.xlu1 %v184_v1, %s1322_s5  ;;  %443 = vrot.lane.b32.xlu0 %v1361_v0, %s1322_s5  ;;  %v586_v0 = vrot.slane %v1543_v47, %v1495_v17  ;;  %v608_v1 = vrot.slane %v1543_v47, %v1513_v31 }
  0x76   : > { %883 = vrot.lane.b32.xlu1 %v1390_v3, %s1322_s5  ;;  %881 = vrot.lane.b32.xlu0 %v1383_v2, %s1322_s5 }
  0x7a   : > { %965 = vrot.lane.b32.xlu1 %v1460_v5, %s1312_s22  ;;  %963 = vrot.lane.b32.xlu0 %v1463_v6, %s1312_s22 }
  0x7e   : > { %987 = vrot.lane.b32.xlu1 %v1460_v5, %s1313_s23  ;;  %985 = vrot.lane.b32.xlu0 %v1463_v6, %s1313_s23 }
  0x82   : > { %1009 = vrot.lane.b32.xlu1 %v1460_v5, %s1314_s24  ;;  %1007 = vrot.lane.b32.xlu0 %v1463_v6, %s1314_s24 }
  0x84   : > { %v206_v13 = vpop.permute.xlu1 %205  ;;  %v192_v14 = vpop.permute.xlu0 %191 }
  0x85   : > { %v211_v15 = vmul.f32 %v206_v13, %v204_v11  ;;  %v197_v16 = vmul.f32 %v192_v14, %v188_v12 }
  0x86   : > { %1031 = vrot.lane.b32.xlu1 %v1460_v5, %s1315_s25  ;;  %1029 = vrot.lane.b32.xlu0 %v1463_v6, %s1315_s25 }
  0x87   : > { %v213_v18 = vadd.f32 %v211_v15, %v197_v16 }
  0x88   : > { %v208_v19 = vpop.permute.xlu1 %207  ;;  %v194_v20 = vpop.permute.xlu0 %193 }
  0x89   : > { %v212_v21 = vmul.f32 %v208_v19, %v204_v11  ;;  %v198_v22 = vmul.f32 %v194_v20, %v188_v12 }
  0x8a   : > { %1053 = vrot.lane.b32.xlu1 %v1460_v5, %s1316_s26  ;;  %1051 = vrot.lane.b32.xlu0 %v1463_v6, %s1316_s26 }
  0x8b   : > { %v214_v25 = vadd.f32 %v212_v21, %v198_v22  ;;  %v1607_v21 = vld [vmem:[%s2165_s1 + $0x28] sm:$0xff] }
  0x8c   : > { %v222_v26 = vpop.permute.xlu1 %221  ;;  %v220_v27 = vpop.permute.xlu0 %219 }
  0x8d   : > { %v226_v28 = vmul.f32 %v222_v26, %v218_v23  ;;  %v225_v29 = vmul.f32 %v220_v27, %v218_v23  ;;  %v624_v26 = vrot.slane %v1543_v47, %v1522_v39 }
  0x8e   : > { %1075 = vrot.lane.b32.xlu1 %v1460_v5, %s1317_s27  ;;  %1073 = vrot.lane.b32.xlu0 %v1463_v6, %s1317_s27 }
  0x8f   : > { %v228_v32 = vadd.f32 %v226_v28, %v214_v25  ;;  %v227_v33 = vadd.f32 %v225_v29, %v213_v18  ;;  %v646_v29 = vrot.slane %v1607_v21, %v1475_v9 }
  0x90   : > { %v236_v34 = vpop.permute.xlu1 %235  ;;  %v234_v35 = vpop.permute.xlu0 %233 }
  0x91   : > { %v240_v36 = vmul.f32 %v236_v34, %v232_v30  ;;  %v239_v37 = vmul.f32 %v234_v35, %v232_v30  ;;  %v654_v30 = vrot.slane %v1607_v21, %v1472_v8 }
  0x92   : > { %1097 = vrot.lane.b32.xlu1 %v1460_v5, %s1318_s28  ;;  %1095 = vrot.lane.b32.xlu0 %v1463_v6, %s1318_s28 }
  0x93   : > { %v242_v40 = vadd.f32 %v240_v36, %v228_v32  ;;  %v241_v41 = vadd.f32 %v239_v37, %v227_v33 }
  0x94   : > { %v1528_v42 = vpop.permute.xlu1 %249  ;;  %v1530_v43 = vpop.permute.xlu0 %247 }
  0x95   : > { %v254_v44 = vmul.f32 %v1528_v42, %v246_v38  ;;  %v253_v45 = vmul.f32 %v1530_v43, %v246_v38 }
  0x96   : > { %1119 = vrot.lane.b32.xlu1 %v1460_v5, %s1319_s29  ;;  %1117 = vrot.lane.b32.xlu0 %v1463_v6, %s1319_s29 }
  0x97   : > { %v256_v48 = vadd.f32 %v254_v44, %v242_v40  ;;  %v255_v49 = vadd.f32 %v253_v45, %v241_v41  ;;  %v312_v45 = vrot.slane %v1548_v50, %v1495_v17 }
  0x98   : > { %v1550_v51 = vpop.permute.xlu1 %271  ;;  %v1552_v52 = vpop.permute.xlu0 %269 }
  0x99   : > { %v276_v53 = vmul.f32 %v1550_v51, %v268_v46  ;;  %v275_v54 = vmul.f32 %v1552_v52, %v268_v46 }
  0x9a   : > { %1133 = vrot.lane.b32.xlu1 %v1460_v5, %s1320_s30  ;;  %1131 = vrot.lane.b32.xlu0 %v1463_v6, %s1320_s30  ;;  %s1323_s30 = smov 64  }
  0x9b   : > { %v278_v58 = vadd.f32 %v276_v53, %v256_v48  ;;  %v277_v59 = vadd.f32 %v275_v54, %v255_v49 }
  0x9c   : > { %v1569_v61 = vpop.permute.xlu1 %549  ;;  %v1571_v62 = vpop.permute.xlu0 %291 }
  0x9d   : > { %2174 = vst [vmem:[#allocation2_spill] sm:$0xff] %v1569_v61  ;;  %v1574_v63 = vmul.f32 %v570_v55, %v1569_v61  ;;  %v297_v11 = vmul.f32 %v1571_v62, %v290_v56  ;;  %v579_v15 = vmul.f32 %v578_v60, %v1569_v61 }
  0x9e   : > { %1147 = vrot.lane.b32.xlu1 %v1460_v5, %s1321_s4  ;;  %1145 = vrot.lane.b32.xlu0 %v1463_v6, %s1321_s4 }
  0x9f   : > { %2175 = vst [vmem:[#allocation3_spill] sm:$0xff] %v1574_v63  ;;  %v299_v12 = vadd.f32 %v297_v11, %v277_v59 }
  0xa0   : > { %v1587_v13 = vpop.permute.xlu1 %587  ;;  %v1589_v14 = vpop.permute.xlu0 %551 }
  0xa1   : > { %2176 = vst [vmem:[#allocation4_spill] sm:$0xff] %v1589_v14  ;;  %v1593_v16 = vmul.f32 %v1587_v13, %v586_v0  ;;  %v1596_v18 = vmul.f32 %v608_v1, %v1587_v13  ;;  %v617_v19 = vmul.f32 %v616_v4, %v1587_v13  ;;  %v1600_v20 = vmul.f32 %v570_v55, %v1589_v14 }
  0xa2   : > { %1161 = vrot.lane.b32.xlu1 %v1460_v5, %s1322_s5  ;;  %1159 = vrot.lane.b32.xlu0 %v1463_v6, %s1322_s5  ;;  %v580_v32 = vmul.f32 %v578_v60, %v1589_v14 }
  0xa3   : > { %2177 = vst [vmem:[#allocation5_spill] sm:$0xff] %v1593_v16  ;;  %2178 = vst [vmem:[#allocation6_spill] sm:$0xff] %v1596_v18  ;;  %v619_v22 = vadd.f32 %v617_v19, %v579_v15 }
  0xa4   : > { %2179 = vst [vmem:[#allocation7_spill] sm:$0xff] %v1600_v20  ;;  %v1611_v23 = vpop.permute.xlu1 %293  ;;  %v1613_v25 = vpop.permute.xlu0 %589 }
  0xa5   : > { %v298_v27 = vmul.f32 %v1611_v23, %v290_v56  ;;  %v1619_v28 = vmul.f32 %v1613_v25, %v586_v0  ;;  %v1627_v33 = vmul.f32 %v608_v1, %v1613_v25  ;;  %v618_v34 = vmul.f32 %v616_v4, %v1613_v25 }
  0xa6   : > { %463 = vrot.lane.b32.xlu1 %v1390_v3, %s1309_s19  ;;  %461 = vrot.lane.b32.xlu0 %v1383_v2, %s1309_s19  ;;  %v684_v0 = vrot.slane %v1607_v21, %v1513_v31  ;;  %v692_v1 = vrot.slane %v1607_v21, %v1565_v57 }
  0xa7   : > { %2180 = vst [vmem:[#allocation8_spill] sm:$0xff] %v1619_v28  ;;  %2181 = vst [vmem:[#allocation9_spill] sm:$0xff] %v1627_v33  ;;  %v300_v35 = vadd.f32 %v298_v27, %v278_v58  ;;  %v620_v36 = vadd.f32 %v618_v34, %v580_v32  ;;  %v662_v58 = vrot.slane %v1607_v21, %v1495_v17  ;;  %v1699_v34 = vld [vmem:[%s2165_s1 + $0x30] sm:$0xff] }
  0xa8   : > { %v1634_v37 = vpop.permute.xlu1 %627  ;;  %v1636_v38 = vpop.permute.xlu0 %625 }
  0xa9   : > { %v1639_v40 = vmul.f32 %v1634_v37, %v624_v26  ;;  %v1642_v41 = vmul.f32 %v646_v29, %v1634_v37  ;;  %v656_v44 = vmul.f32 %v654_v30, %v1634_v37  ;;  %v1648_v46 = vmul.f32 %v1636_v38, %v624_v26 }
  0xaa   : > { %v1651_v48 = vmul.f32 %v646_v29, %v1636_v38  ;;  %v655_v49 = vmul.f32 %v654_v30, %v1636_v38  ;;  %485 = vrot.lane.b32.xlu1 %v1390_v3, %s1308_s18  ;;  %483 = vrot.lane.b32.xlu0 %v1383_v2, %s1308_s18  ;;  %v334_v29 = vrot.slane %v1548_v50, %v1513_v31 }
  0xab   : > { %2182 = vst [vmem:[#allocation10_spill] sm:$0xff] %v1639_v40  ;;  %2183 = vst [vmem:[#allocation11_spill] sm:$0xff] %v1642_v41  ;;  %v658_v53 = vadd.f32 %v656_v44, %v620_v36 }
  0xac   : > { %2184 = vst [vmem:[#allocation12_spill] sm:$0xff] %v1648_v46  ;;  %2185 = vst [vmem:[#allocation13_spill] sm:$0xff] %v1651_v48  ;;  %v657_v54 = vadd.f32 %v655_v49, %v619_v22  ;;  %v1658_v55 = vpop.permute.xlu1 %315  ;;  %v1660_v56 = vpop.permute.xlu0 %313 }
  0xad   : > { %v320_v59 = vmul.f32 %v1658_v55, %v312_v45  ;;  %v319_v60 = vmul.f32 %v1660_v56, %v312_v45 }
  0xae   : > { %507 = vrot.lane.b32.xlu1 %v1390_v3, %s1310_s20  ;;  %505 = vrot.lane.b32.xlu0 %v1383_v2, %s1310_s20 }
  0xaf   : > { %v322_v4 = vadd.f32 %v320_v59, %v300_v35  ;;  %v321_v11 = vadd.f32 %v319_v60, %v299_v12 }
  0xb0   : > { %v1674_v15 = vpop.permute.xlu1 %665  ;;  %v1676_v19 = vpop.permute.xlu0 %663 }
  0xb1   : > { %v1679_v22 = vmul.f32 %v1674_v15, %v662_v58  ;;  %v1682_v26 = vmul.f32 %v684_v0, %v1674_v15  ;;  %v694_v27 = vmul.f32 %v692_v1, %v1674_v15  ;;  %v1688_v12 = vmul.f32 %v1676_v19, %v662_v58 }
  0xb2   : > { %v1691_v30 = vmul.f32 %v684_v0, %v1676_v19  ;;  %v693_v32 = vmul.f32 %v692_v1, %v1676_v19  ;;  %529 = vrot.lane.b32.xlu1 %v1390_v3, %s1311_s21  ;;  %527 = vrot.lane.b32.xlu0 %v1383_v2, %s1311_s21  ;;  %v700_v58 = vrot.slane %v1607_v21, %v1522_v39 }
  0xb3   : > { %2186 = vst [vmem:[#allocation14_spill] sm:$0xff] %v1679_v22  ;;  %2187 = vst [vmem:[#allocation15_spill] sm:$0xff] %v1682_v26  ;;  %v1701_v35 = vadd.f32 %v694_v27, %v658_v53  ;;  %v722_v53 = vrot.slane %v1699_v34, %v1475_v9  ;;  %v356_v27 = vrot.slane %v1548_v50, %v1522_v39 }
  0xb4   : > { %2188 = vst [vmem:[#allocation16_spill] sm:$0xff] %v1688_v12  ;;  %2189 = vst [vmem:[#allocation17_spill] sm:$0xff] %v1691_v30  ;;  %v1705_v36 = vadd.f32 %v693_v32, %v657_v54  ;;  %v1707_v44 = vpop.permute.xlu1 %337  ;;  %v1709_v45 = vpop.permute.xlu0 %335 }
  0xb5   : > { %v342_v49 = vmul.f32 %v1707_v44, %v334_v29  ;;  %v341_v3 = vmul.f32 %v1709_v45, %v334_v29 }
  0xb6   : > { %909 = vrot.lane.b32.xlu1 %v1460_v5, %s1309_s19  ;;  %907 = vrot.lane.b32.xlu0 %v1463_v6, %s1309_s19 }
  0xb7   : > { %v344_v2 = vadd.f32 %v342_v49, %v322_v4  ;;  %v343_v54 = vadd.f32 %v341_v3, %v321_v11 }
  0xb8   : > { %v1721_v59 = vpop.permute.xlu1 %703  ;;  %v1723_v60 = vpop.permute.xlu0 %701 }
  0xb9   : > { %v1726_v0 = vmul.f32 %v1721_v59, %v700_v58  ;;  %v1729_v1 = vmul.f32 %v722_v53, %v1721_v59  ;;  %v1734_v29 = vmul.f32 %v1723_v60, %v700_v58  ;;  %v1737_v4 = vmul.f32 %v722_v53, %v1723_v60 }
  0xba   : > { %923 = vrot.lane.b32.xlu1 %v1460_v5, %s1308_s18  ;;  %921 = vrot.lane.b32.xlu0 %v1463_v6, %s1308_s18  ;;  %v738_v58 = vrot.slane %v1699_v34, %v1495_v17  ;;  %v760_v53 = vrot.slane %v1699_v34, %v1513_v31 }
  0xbb   : > { %2190 = vst [vmem:[#allocation18_spill] sm:$0xff] %v1726_v0  ;;  %2191 = vst [vmem:[#allocation19_spill] sm:$0xff] %v1729_v1 }
  0xbc   : > { %2192 = vst [vmem:[#allocation20_spill] sm:$0xff] %v1734_v29  ;;  %2193 = vst [vmem:[#allocation21_spill] sm:$0xff] %v1737_v4  ;;  %v1743_v11 = vpop.permute.xlu1 %359  ;;  %v1745_v32 = vpop.permute.xlu0 %357  ;;  %v1758_v29 = vld [vmem:[%s2165_s1 + $0x10] sm:$0xff] }
  0xbd   : > { %v364_v49 = vmul.f32 %v1743_v11, %v356_v27  ;;  %v363_v3 = vmul.f32 %v1745_v32, %v356_v27  ;;  %v378_v26 = vrot.slane %v1758_v29, %v1475_v9 }
  0xbe   : > { %937 = vrot.lane.b32.xlu1 %v1460_v5, %s1310_s20  ;;  %935 = vrot.lane.b32.xlu0 %v1463_v6, %s1310_s20 }
  0xbf   : > { %v366_v4 = vadd.f32 %v364_v49, %v344_v2  ;;  %v365_v0 = vadd.f32 %v363_v3, %v343_v54  ;;  %v1785_v54 = vld [vmem:[%s2165_s1 + $0x38] sm:$0xff] }
  0xc0   : > { %v1762_v27 = vpop.permute.xlu1 %741  ;;  %v1764_v1 = vpop.permute.xlu0 %739 }
  0xc1   : > { %v1767_v30 = vmul.f32 %v1762_v27, %v738_v58  ;;  %v1770_v12 = vmul.f32 %v760_v53, %v1762_v27  ;;  %v1775_v22 = vmul.f32 %v1764_v1, %v738_v58  ;;  %v1778_v2 = vmul.f32 %v760_v53, %v1764_v1 }
  0xc2   : > { %951 = vrot.lane.b32.xlu1 %v1460_v5, %s1311_s21  ;;  %949 = vrot.lane.b32.xlu0 %v1463_v6, %s1311_s21  ;;  %v776_v58 = vrot.slane %v1699_v34, %v1522_v39  ;;  %v798_v53 = vrot.slane %v1785_v54, %v1475_v9  ;;  %v1802_v6 = vsub.s32 7, %v1465_v7  ;;  %v260_v7 = vrot.slane %v1484_v10, %v1565_v57 }
  0xc3   : > { %2194 = vst [vmem:[#allocation22_spill] sm:$0xff] %v1767_v30  ;;  %2195 = vst [vmem:[#allocation23_spill] sm:$0xff] %v1770_v12 }
  0xc4   : > { %2196 = vst [vmem:[#allocation24_spill] sm:$0xff] %v1775_v22  ;;  %2197 = vst [vmem:[#allocation25_spill] sm:$0xff] %v1778_v2  ;;  %v382_v49 = vpop.permute.xlu1 %381  ;;  %v380_v3 = vpop.permute.xlu0 %379  ;;  %v262_v18 = vmul.f32 %v260_v7, %v1528_v42  ;;  %v370_v28 = vrot.slane %v1548_v50, %v1802_v6  ;;  %v392_v42 = vrot.slane %v1758_v29, %v1472_v8 }
  0xc5   : > { %v386_v30 = vmul.f32 %v382_v49, %v378_v26  ;;  %v385_v12 = vmul.f32 %v380_v3, %v378_v26 }
  0xc7   : > { %v1793_v22 = vadd.f32 %v386_v30, %v366_v4  ;;  %v1795_v5 = vadd.f32 %v385_v12, %v365_v0  ;;  %v282_v4 = vrot.slane %v1484_v10, %v1802_v6  ;;  %v261_v10 = vmul.f32 %v260_v7, %v1530_v43 }
  0xc8   : > { %v1797_v2 = vpop.permute.xlu1 %779  ;;  %v1799_v48 = vpop.permute.xlu0 %777 }
  0xc9   : > { %2198 = vst [vmem:[#allocation26_spill] sm:$0xff] %v1793_v22  ;;  %2199 = vst [vmem:[#allocation27_spill] sm:$0xff] %v1795_v5  ;;  %v1805_v46 = vmul.f32 %v1797_v2, %v776_v58  ;;  %v1808_v26 = vmul.f32 %v798_v53, %v1797_v2  ;;  %v1811_v41 = vmul.f32 %v1799_v48, %v776_v58 }
  0xca   : > { %v1814_v30 = vmul.f32 %v798_v53, %v1799_v48  ;;  %v284_v58 = vmul.f32 %v282_v4, %v1550_v51  ;;  %v283_v53 = vmul.f32 %v282_v4, %v1552_v52 }
  0xcb   : > { %2200 = vst [vmem:[#allocation28_spill] sm:$0xff] %v1805_v46  ;;  %2201 = vst [vmem:[#allocation29_spill] sm:$0xff] %v1808_v26  ;;  %v304_v46 = vrot.slane %v1548_v50, %v1472_v8 }
  0xcc   : > { %2202 = vst [vmem:[#allocation30_spill] sm:$0xff] %v1811_v41  ;;  %2203 = vst [vmem:[#allocation31_spill] sm:$0xff] %v1814_v30  ;;  %v404_v12 = vpop.permute.xlu1 %403  ;;  %v402_v0 = vpop.permute.xlu0 %401  ;;  %v326_v41 = vrot.slane %v1548_v50, %v1504_v24  ;;  %v348_v30 = vrot.slane %v1548_v50, %v1565_v57  ;;  %v286_v52 = vadd.f32 %v284_v58, %v262_v18 }
  0xcd   : > { %v305_v16 = vmul.f32 %v304_v46, %v1571_v62  ;;  %v306_v33 = vmul.f32 %v304_v46, %v1611_v23  ;;  %v285_v4 = vadd.f32 %v283_v53, %v261_v10  ;;  %v400_v50 = vrot.slane %v1758_v29, %v1495_v17 }
  0xce   : > { %v328_v20 = vmul.f32 %v326_v41, %v1658_v55  ;;  %v327_v5 = vmul.f32 %v326_v41, %v1660_v56  ;;  %v350_v62 = vmul.f32 %v348_v30, %v1707_v44  ;;  %v349_v23 = vmul.f32 %v348_v30, %v1709_v45 }
  0xcf   : > { %v307_v22 = vadd.f32 %v305_v16, %v285_v4  ;;  %v308_v43 = vadd.f32 %v306_v33, %v286_v52  ;;  %v372_v41 = vmul.f32 %v370_v28, %v1743_v11  ;;  %v371_v56 = vmul.f32 %v370_v28, %v1745_v32  ;;  %v1859_v32 = vld [vmem:[%s2165_s1 + $0x18] sm:$0xff] }
  0xd0   : > { %v1822_v40 = vpop.permute.xlu1 %817  ;;  %v1824_v26 = vpop.permute.xlu0 %815  ;;  %v414_v16 = vrot.slane %v1758_v29, %v1504_v24  ;;  %v394_v58 = vmul.f32 %v392_v42, %v382_v49  ;;  %v393_v45 = vmul.f32 %v392_v42, %v380_v3  ;;  %v428_v30 = vrot.slane %v1758_v29, %v1513_v31  ;;  %2204 = vst [vmem:[#allocation32_spill] sm:$0xff] %v1859_v32 }
  0xd1   : > { %v330_v7 = vadd.f32 %v328_v20, %v308_v43  ;;  %v329_v55 = vadd.f32 %v327_v5, %v307_v22  ;;  %v408_v20 = vmul.f32 %v404_v12, %v400_v50  ;;  %v407_v22 = vmul.f32 %v402_v0, %v400_v50 }
  0xd2   : > { %v442_v42 = vrot.slane %v1758_v29, %v1565_v57 }
  0xd3   : > { %v352_v33 = vadd.f32 %v350_v62, %v330_v7  ;;  %v351_v44 = vadd.f32 %v349_v23, %v329_v55  ;;  %v600_v7 = vrot.slane %v1543_v47, %v1504_v24  ;;  %v638_v55 = vrot.slane %v1543_v47, %v1802_v6 }
  0xd4   : > { %v418_v51 = vpop.permute.xlu1 %417  ;;  %v416_v63 = vpop.permute.xlu0 %415  ;;  %v768_v47 = vrot.slane %v1699_v34, %v1565_v57 }
  0xd5   : > { %v374_v52 = vadd.f32 %v372_v41, %v352_v33  ;;  %v373_v4 = vadd.f32 %v371_v56, %v351_v44  ;;  %v422_v43 = vmul.f32 %v418_v51, %v414_v16  ;;  %v421_v28 = vmul.f32 %v416_v63, %v414_v16 }
  0xd6   : > { %v562_v51 = vrot.slane %v1859_v32, %v1802_v6  ;;  %v676_v41 = vrot.slane %v1607_v21, %v1504_v24 }
  0xd7   : > { %v396_v5 = vadd.f32 %v394_v58, %v374_v52  ;;  %v395_v11 = vadd.f32 %v393_v45, %v373_v4 }
  0xd8   : > { %v1846_v46 = vpop.permute.xlu1 %839  ;;  %v1848_v18 = vpop.permute.xlu0 %837  ;;  %v563_v52 = vmul.f32 %v562_v51, %v1569_v61  ;;  %v564_v4 = vmul.f32 %v562_v51, %v1589_v14  ;;  %v1909_v51 = vld [vmem:[%s2165_s1 + $0x48] sm:$0xff] }
  0xd9   : > { %v410_v62 = vadd.f32 %v408_v20, %v396_v5  ;;  %v409_v23 = vadd.f32 %v407_v22, %v395_v11  ;;  %v790_v5 = vrot.slane %v1699_v34, %v1802_v6  ;;  %v814_v11 = vrot.slane %v1785_v54, %v1495_v17 }
  0xda   : > { %v1050_v61 = vrot.slane %v1909_v51, %v1522_v39 }
  0xdb   : > { %v424_v63 = vadd.f32 %v422_v43, %v410_v62  ;;  %v423_v50 = vadd.f32 %v421_v28, %v409_v23  ;;  %v1893_v43 = vrot.slane %v1785_v54, %v1504_v24  ;;  %v601_v62 = vmul.f32 %v600_v7, %v1587_v13 }
  0xdc   : > { %v432_v53 = vpop.permute.xlu1 %431  ;;  %v430_v10 = vpop.permute.xlu0 %429  ;;  %v602_v23 = vmul.f32 %v600_v7, %v1613_v25  ;;  %v1915_v13 = vrot.slane %v1785_v54, %v1565_v57  ;;  %v1919_v25 = vrot.slane %v1785_v54, %v1522_v39  ;;  %v640_v7 = vmul.f32 %v638_v55, %v1634_v37 }
  0xdd   : > { %v436_v12 = vmul.f32 %v432_v53, %v428_v30  ;;  %v435_v0 = vmul.f32 %v430_v10, %v428_v30  ;;  %v714_v30 = vrot.slane %v1607_v21, %v1802_v6  ;;  %v730_v53 = vrot.slane %v1699_v34, %v1472_v8 }
  0xde   : > { %v752_v10 = vrot.slane %v1699_v34, %v1504_v24  ;;  %v806_v21 = vrot.slane %v1785_v54, %v1472_v8  ;;  %v984_v37 = vrot.slane %v1909_v51, %v1475_v9 }
  0xdf   : > { %v438_v33 = vadd.f32 %v436_v12, %v424_v63  ;;  %v437_v44 = vadd.f32 %v435_v0, %v423_v50  ;;  %v1904_v0 = vld [vmem:[%s2165_s1 + $0x40] sm:$0xff]  ;;  %v836_v63 = vrot.slane %v1785_v54, %v1513_v31  ;;  %v1923_v50 = vrot.slane %v1785_v54, %v1802_v6 }
  0xe0   : > { %v1861_v49 = vpop.permute.xlu1 %861  ;;  %v1863_v3 = vpop.permute.xlu0 %859  ;;  %2205 = vst [vmem:[#allocation33_spill] sm:$0xff] %v1904_v0  ;;  %v753_v14 = vmul.f32 %v752_v10, %v1764_v1 }
  0xe4   : > { %v446_v56 = vpop.permute.xlu1 %445  ;;  %v444_v16 = vpop.permute.xlu0 %443 }
  0xe5   : > { %v450_v58 = vmul.f32 %v446_v56, %v442_v42  ;;  %v449_v45 = vmul.f32 %v444_v16, %v442_v42  ;;  %v639_v56 = vmul.f32 %v638_v55, %v1636_v38  ;;  %v678_v38 = vmul.f32 %v676_v41, %v1674_v15 }
  0xe6   : > { %v677_v55 = vmul.f32 %v676_v41, %v1676_v19  ;;  %v715_v15 = vmul.f32 %v714_v30, %v1723_v60  ;;  %v731_v41 = vmul.f32 %v730_v53, %v1723_v60 }
  0xe7   : > { %v452_v20 = vadd.f32 %v450_v58, %v438_v33  ;;  %v451_v22 = vadd.f32 %v449_v45, %v437_v44  ;;  %v1929_v44 = vrot.slane %v1904_v0, %v1475_v9  ;;  %v1933_v58 = vrot.slane %v1904_v0, %v1472_v8 }
  0xe8   : > { %v1895_v28 = vpop.permute.xlu1 %883  ;;  %v1897_v42 = vpop.permute.xlu0 %881  ;;  %v1937_v45 = vrot.slane %v1904_v0, %v1802_v6 }
  0xe9   : > { %v566_v12 = vadd.f32 %v564_v4, %v452_v20  ;;  %v565_v34 = vadd.f32 %v563_v52, %v451_v22  ;;  %v732_v22 = vmul.f32 %v730_v53, %v1721_v59  ;;  %v769_v53 = vmul.f32 %v768_v47, %v1764_v1 }
  0xeb   : > { %v604_v16 = vadd.f32 %v602_v23, %v566_v12  ;;  %v603_v33 = vadd.f32 %v601_v62, %v565_v34  ;;  %v1950_v62 = vrot.slane %v1909_v51, %v1472_v8  ;;  %v1006_v23 = vrot.slane %v1909_v51, %v1495_v17 }
  0xec   : > { %v1939_v54 = vpop.permute.xlu1 %965  ;;  %v1941_v52 = vpop.permute.xlu0 %963  ;;  %v1028_v12 = vrot.slane %v1909_v51, %v1513_v31  ;;  %v716_v34 = vmul.f32 %v714_v30, %v1721_v59  ;;  %v734_v60 = vadd.f32 %v732_v22, %v1701_v35  ;;  %v822_v35 = vmul.f32 %v1822_v40, %v814_v11 }
  0xed   : > { %v642_v4 = vadd.f32 %v640_v7, %v604_v16  ;;  %v641_v20 = vadd.f32 %v639_v56, %v603_v33  ;;  %v754_v7 = vmul.f32 %v752_v10, %v1762_v27  ;;  %v770_v56 = vmul.f32 %v768_v47, %v1762_v27 }
  0xee   : > { %v808_v27 = vmul.f32 %v806_v21, %v1797_v2  ;;  %v821_v47 = vmul.f32 %v1824_v26, %v814_v11 }
  0xef   : > { %v680_v0 = vadd.f32 %v678_v38, %v642_v4  ;;  %v679_v19 = vadd.f32 %v677_v55, %v641_v20  ;;  %v792_v55 = vmul.f32 %v790_v5, %v1797_v2  ;;  %v791_v4 = vmul.f32 %v790_v5, %v1799_v48 }
  0xf0   : > { %v1961_v16 = vpop.permute.xlu1 %987  ;;  %v1963_v33 = vpop.permute.xlu0 %985 }
  0xf1   : > { %v718_v59 = vadd.f32 %v716_v34, %v680_v0  ;;  %v717_v32 = vadd.f32 %v715_v15, %v679_v19  ;;  %v1969_v30 = vmul.f32 %v1961_v16, %v984_v37  ;;  %v1975_v38 = vmul.f32 %v1963_v33, %v984_v37 }
  0xf2   : > { %v733_v0 = vadd.f32 %v731_v41, %v1705_v36  ;;  %v807_v34 = vmul.f32 %v806_v21, %v1799_v48  ;;  %v772_v15 = vadd.f32 %v770_v56, %v734_v60  ;;  %v843_v21 = vmul.f32 %v1848_v18, %v836_v63 }
  0xf3   : > { %v756_v20 = vadd.f32 %v754_v7, %v718_v59  ;;  %v755_v10 = vadd.f32 %v753_v14, %v717_v32  ;;  %v830_v14 = vmul.f32 %v1893_v43, %v1822_v40  ;;  %v844_v32 = vmul.f32 %v1846_v46, %v836_v63 }
  0xf4   : > { %v1982_v22 = vpop.permute.xlu1 %1009  ;;  %v1984_v1 = vpop.permute.xlu0 %1007  ;;  %v810_v5 = vadd.f32 %v808_v27, %v772_v15  ;;  %v771_v36 = vadd.f32 %v769_v53, %v733_v0  ;;  %v829_v56 = vmul.f32 %v1893_v43, %v1824_v26  ;;  %v852_v59 = vmul.f32 %v1915_v13, %v1846_v46 }
  0xf5   : > { %v794_v37 = vadd.f32 %v792_v55, %v756_v20  ;;  %v793_v19 = vadd.f32 %v791_v4, %v755_v10  ;;  %v1988_v2 = vmul.f32 %v1982_v22, %v1006_v23  ;;  %v1993_v48 = vmul.f32 %v1984_v1, %v1006_v23  ;;  %v2010_v4 = vld [vmem:[%s2165_s1 + $0x50] sm:$0xff] }
  0xf6   : > { %v809_v11 = vadd.f32 %v807_v34, %v771_v36  ;;  %v866_v40 = vmul.f32 %v1861_v49, %v1919_v25  ;;  %v865_v23 = vmul.f32 %v1863_v3, %v1919_v25  ;;  %v832_v26 = vadd.f32 %v830_v14, %v810_v5 }
  0xf7   : > { %v824_v41 = vadd.f32 %v822_v35, %v794_v37  ;;  %v823_v7 = vadd.f32 %v821_v47, %v793_v19  ;;  %v851_v46 = vmul.f32 %v1915_v13, %v1848_v18  ;;  %v874_v43 = vmul.f32 %v1923_v50, %v1861_v49 }
  0xf8   : > { %v1032_v60 = vpop.permute.xlu1 %1031  ;;  %v1030_v53 = vpop.permute.xlu0 %1029  ;;  %v888_v25 = vmul.f32 %v1895_v28, %v1929_v44  ;;  %v887_v34 = vmul.f32 %v1897_v42, %v1929_v44  ;;  %v831_v15 = vadd.f32 %v829_v56, %v809_v11  ;;  %v854_v35 = vadd.f32 %v852_v59, %v832_v26 }
  0xf9   : > { %v846_v27 = vadd.f32 %v844_v32, %v824_v41  ;;  %v845_v55 = vadd.f32 %v843_v21, %v823_v7  ;;  %v2005_v63 = vmul.f32 %v1032_v60, %v1028_v12  ;;  %v2016_v20 = vmul.f32 %v1030_v53, %v1028_v12 }
  0xfa   : > { %v873_v47 = vmul.f32 %v1923_v50, %v1863_v3  ;;  %v1072_v49 = vrot.slane %v2010_v4, %v1475_v9  ;;  %v896_v12 = vmul.f32 %v1933_v58, %v1895_v28  ;;  %v853_v14 = vadd.f32 %v851_v46, %v831_v15 }
  0xfb   : > { %v868_v10 = vadd.f32 %v866_v40, %v846_v27  ;;  %v867_v0 = vadd.f32 %v865_v23, %v845_v55  ;;  %v895_v44 = vmul.f32 %v1933_v58, %v1897_v42  ;;  %v876_v32 = vadd.f32 %v874_v43, %v854_v35 }
  0xfc   : > { %v1054_v37 = vpop.permute.xlu1 %1053  ;;  %v1052_v18 = vpop.permute.xlu0 %1051  ;;  %v978_v3 = vmul.f32 %v1937_v45, %v1939_v54  ;;  %v1020_v50 = vrot.slane %v1909_v51, %v1504_v24  ;;  %v875_v28 = vadd.f32 %v873_v47, %v853_v14  ;;  %v977_v21 = vmul.f32 %v1937_v45, %v1941_v52 }
  0xfd   : > { %v890_v13 = vadd.f32 %v888_v25, %v868_v10  ;;  %v889_v19 = vadd.f32 %v887_v34, %v867_v0  ;;  %v2028_v5 = vmul.f32 %v1054_v37, %v1050_v61  ;;  %v2032_v36 = vmul.f32 %v1052_v18, %v1050_v61 }
  0xfe   : > { %v1042_v61 = vrot.slane %v1909_v51, %v1565_v57  ;;  %v1094_v41 = vrot.slane %v2010_v4, %v1495_v17  ;;  %v898_v7 = vadd.f32 %v896_v12, %v876_v32  ;;  %v1000_v11 = vmul.f32 %v1950_v62, %v1961_v16 }
  0xff   : > { %1173 = vrot.lane.b32.xlu1 %v890_v13, %s1323_s30  ;;  %1171 = vrot.lane.b32.xlu0 %v889_v19, %s1323_s30  ;;  %v897_v40 = vadd.f32 %v895_v44, %v875_v28  ;;  %v999_v45 = vmul.f32 %v1950_v62, %v1963_v33  ;;  %v1022_v27 = vmul.f32 %v1020_v50, %v1982_v22 }
 0x100   : > { %v1076_v42 = vpop.permute.xlu1 %1075  ;;  %v1074_v58 = vpop.permute.xlu0 %1073  ;;  %v980_v23 = vadd.f32 %v978_v3, %v898_v7  ;;  %v1064_v55 = vrot.slane %v1909_v51, %v1802_v6  ;;  %v1021_v46 = vmul.f32 %v1020_v50, %v1984_v1  ;;  %v1086_v16 = vrot.slane %v2010_v4, %v1472_v8 }
 0x101   : > { %v2048_v56 = vmul.f32 %v1076_v42, %v1072_v49  ;;  %v2050_v59 = vmul.f32 %v1074_v58, %v1072_v49  ;;  %v979_v26 = vadd.f32 %v977_v21, %v897_v40  ;;  %v1044_v0 = vmul.f32 %v1042_v61, %v1032_v60 }
 0x102   : > { %v1002_v25 = vadd.f32 %v1000_v11, %v980_v23  ;;  %v1043_v33 = vmul.f32 %v1042_v61, %v1030_v53  ;;  %v1066_v35 = vmul.f32 %v1064_v55, %v1054_v37  ;;  %v1108_v51 = vrot.slane %v2010_v4, %v1504_v24 }
 0x103   : > { %v1001_v62 = vadd.f32 %v999_v45, %v979_v26  ;;  %v1065_v1 = vmul.f32 %v1064_v55, %v1052_v18  ;;  %v1088_v19 = vmul.f32 %v1086_v16, %v1076_v42  ;;  %v1116_v60 = vrot.slane %v2010_v4, %v1513_v31 }
 0x104   : > { %v1098_v43 = vpop.permute.xlu1 %1097  ;;  %v1096_v10 = vpop.permute.xlu0 %1095  ;;  %v1024_v22 = vadd.f32 %v1022_v27, %v1002_v25  ;;  %v1087_v44 = vmul.f32 %v1086_v16, %v1074_v58  ;;  %v1130_v53 = vrot.slane %v2010_v4, %v1565_v57 }
 0x105   : > { %v2060_v34 = vmul.f32 %v1098_v43, %v1094_v41  ;;  %v2062_v15 = vmul.f32 %v1096_v10, %v1094_v41  ;;  %v1023_v47 = vadd.f32 %v1021_v46, %v1001_v62  ;;  %v1110_v3 = vmul.f32 %v1108_v51, %v1098_v43 }
 0x106   : > { %v1046_v12 = vadd.f32 %v1044_v0, %v1024_v22  ;;  %v1109_v50 = vmul.f32 %v1108_v51, %v1096_v10  ;;  %v1144_v41 = vrot.slane %v2010_v4, %v1522_v39  ;;  %v1158_v46 = vrot.slane %v2010_v4, %v1802_v6 }
 0x107   : > { %v1045_v14 = vadd.f32 %v1043_v33, %v1023_v47 }
 0x108   : > { %v1120_v49 = vpop.permute.xlu1 %1119  ;;  %v1118_v13 = vpop.permute.xlu0 %1117  ;;  %v1068_v32 = vadd.f32 %v1066_v35, %v1046_v12  ;;  %v458_v12 = vrot.slane %v1758_v29, %v1522_v39 }
 0x109   : > { %v1067_v37 = vadd.f32 %v1065_v1, %v1045_v14  ;;  %v1124_v18 = vmul.f32 %v1120_v49, %v1116_v60  ;;  %v1123_v7 = vmul.f32 %v1118_v13, %v1116_v60  ;;  %v474_v1 = vrot.slane %v1758_v29, %v1802_v6 }
 0x10a   : > { %v1090_v61 = vadd.f32 %v1088_v19, %v1068_v32  ;;  %v2206_v19 = vld [vmem:[#allocation32_spill] sm:$0xff] }
 0x10b   : > { %v1089_v42 = vadd.f32 %v1087_v44, %v1067_v37  ;;  %v496_v60 = vrot.slane %v2206_v19, %v1472_v8  ;;  %v482_v44 = vrot.slane %v2206_v19, %v1475_v9  ;;  %v504_v29 = vrot.slane %v2206_v19, %v1495_v17 }
 0x10c   : > { %v1134_v28 = vpop.permute.xlu1 %1133  ;;  %v1132_v21 = vpop.permute.xlu0 %1131  ;;  %v1112_v11 = vadd.f32 %v1110_v3, %v1090_v61 }
 0x10d   : > { %v1138_v40 = vmul.f32 %v1134_v28, %v1130_v53  ;;  %v1111_v45 = vadd.f32 %v1109_v50, %v1089_v42  ;;  %v1137_v58 = vmul.f32 %v1132_v21, %v1130_v53  ;;  %v518_v50 = vrot.slane %v2206_v19, %v1504_v24 }
 0x10e   : > { %v1126_v55 = vadd.f32 %v1124_v18, %v1112_v11  ;;  %v526_v11 = vrot.slane %v2206_v19, %v1513_v31 }
 0x10f   : > { %v1125_v16 = vadd.f32 %v1123_v7, %v1111_v45 }
 0x110   : > { %v1148_v23 = vpop.permute.xlu1 %1147  ;;  %v1146_v27 = vpop.permute.xlu0 %1145  ;;  %v1140_v10 = vadd.f32 %v1138_v40, %v1126_v55  ;;  %v2207_v40 = vld [vmem:[#allocation26_spill] sm:$0xff]  ;;  %v540_v55 = vrot.slane %v2206_v19, %v1565_v57 }
 0x111   : > { %v1152_v26 = vmul.f32 %v1148_v23, %v1144_v41  ;;  %v1151_v43 = vmul.f32 %v1146_v27, %v1144_v41  ;;  %v1139_v25 = vadd.f32 %v1137_v58, %v1125_v16 }
 0x113   : > { %v1154_v62 = vadd.f32 %v1152_v26, %v1140_v10  ;;  %v1153_v35 = vadd.f32 %v1151_v43, %v1139_v25  ;;  %v2208_v26 = vld [vmem:[#allocation27_spill] sm:$0xff] }
 0x114   : > { %v1162_v0 = vpop.permute.xlu1 %1161  ;;  %v1160_v22 = vpop.permute.xlu0 %1159 }
 0x115   : > { %v1166_v33 = vmul.f32 %v1162_v0, %v1158_v46  ;;  %v1165_v51 = vmul.f32 %v1160_v22, %v1158_v46  ;;  %v548_v0 = vrot.slane %v2206_v19, %v1522_v39 }
 0x117   : > { %v1168_v47 = vadd.f32 %v1166_v33, %v1154_v62  ;;  %v1167_v49 = vadd.f32 %v1165_v51, %v1153_v35 }
 0x118   : > { %v464_v13 = vpop.permute.xlu1 %463  ;;  %v462_v4 = vpop.permute.xlu0 %461 }
 0x119   : > { %1181 = vrot.lane.b32.xlu1 %v1168_v47, %s1323_s30  ;;  %1179 = vrot.lane.b32.xlu0 %v1167_v49, %s1323_s30  ;;  %v476_v14 = vmul.f32 %v474_v1, %v464_v13  ;;  %v475_v32 = vmul.f32 %v474_v1, %v462_v4  ;;  %v468_v6 = vmul.f32 %v464_v13, %v458_v12 }
 0x11a   : > { %v467_v28 = vmul.f32 %v462_v4, %v458_v12  ;;  %v2209_v4 = vld [vmem:[#allocation4_spill] sm:$0xff] }
 0x11b   : > { %v470_v45 = vadd.f32 %v468_v6, %v2207_v40  ;;  %v2215_v40 = vld [vmem:[#allocation5_spill] sm:$0xff] }
 0x11c   : > { %v486_v3 = vpop.permute.xlu1 %485  ;;  %v484_v37 = vpop.permute.xlu0 %483  ;;  %v469_v46 = vadd.f32 %v467_v28, %v2208_v26 }
 0x11d   : > { %v498_v53 = vmul.f32 %v496_v60, %v486_v3  ;;  %v497_v21 = vmul.f32 %v496_v60, %v484_v37  ;;  %v490_v61 = vmul.f32 %v486_v3, %v482_v44  ;;  %v489_v41 = vmul.f32 %v484_v37, %v482_v44 }
 0x11e   : > { %v556_v60 = vmul.f32 %v2209_v4, %v548_v0 }
 0x11f   : > { %v500_v18 = vadd.f32 %v498_v53, %v476_v14  ;;  %v499_v42 = vadd.f32 %v497_v21, %v475_v32  ;;  %v492_v10 = vadd.f32 %v490_v61, %v470_v45  ;;  %v491_v62 = vadd.f32 %v489_v41, %v469_v46  ;;  %v2210_v32 = vld [vmem:[#allocation2_spill] sm:$0xff]  ;;  %v2212_v61 = vld [vmem:[#allocation3_spill] sm:$0xff]  ;;  %v2213_v41 = vld [vmem:[#allocation8_spill] sm:$0xff] }
 0x120   : > { %v508_v7 = vpop.permute.xlu1 %507  ;;  %v506_v27 = vpop.permute.xlu0 %505  ;;  %v555_v3 = vmul.f32 %v2210_v32, %v548_v0  ;;  %v2218_v46 = vld [vmem:[#allocation11_spill] sm:$0xff]  ;;  %v2220_v0 = vld [vmem:[#allocation13_spill] sm:$0xff] }
 0x121   : > { %v512_v58 = vmul.f32 %v508_v7, %v504_v29  ;;  %v520_v23 = vmul.f32 %v518_v50, %v508_v7  ;;  %v511_v16 = vmul.f32 %v506_v27, %v504_v29  ;;  %v519_v43 = vmul.f32 %v518_v50, %v506_v27  ;;  %v2211_v29 = vld [vmem:[#allocation7_spill] sm:$0xff]  ;;  %v2214_v7 = vld [vmem:[#allocation9_spill] sm:$0xff] }
 0x123   : > { %v522_v25 = vadd.f32 %v520_v23, %v500_v18  ;;  %v521_v33 = vadd.f32 %v519_v43, %v499_v42  ;;  %v514_v35 = vadd.f32 %v512_v58, %v492_v10  ;;  %v513_v49 = vadd.f32 %v511_v16, %v491_v62  ;;  %v2216_v58 = vld [vmem:[#allocation6_spill] sm:$0xff]  ;;  %v2219_v10 = vld [vmem:[#allocation12_spill] sm:$0xff] }
 0x124   : > { %v530_v22 = vpop.permute.xlu1 %529  ;;  %v528_v1 = vpop.permute.xlu0 %527 }
 0x125   : > { %v534_v51 = vmul.f32 %v530_v22, %v526_v11  ;;  %v542_v47 = vmul.f32 %v540_v55, %v530_v22  ;;  %v533_v13 = vmul.f32 %v528_v1, %v526_v11  ;;  %v541_v12 = vmul.f32 %v540_v55, %v528_v1  ;;  %v2217_v55 = vld [vmem:[#allocation10_spill] sm:$0xff] }
 0x127   : > { %v536_v14 = vadd.f32 %v534_v51, %v514_v35  ;;  %v544_v44 = vadd.f32 %v542_v47, %v522_v25  ;;  %v535_v6 = vadd.f32 %v533_v13, %v513_v49  ;;  %v543_v53 = vadd.f32 %v541_v12, %v521_v33  ;;  %v2221_v33 = vld [vmem:[#allocation14_spill] sm:$0xff]  ;;  %v2222_v35 = vld [vmem:[#allocation33_spill] sm:$0xff]  ;;  %v2223_v47 = vld [vmem:[#allocation15_spill] sm:$0xff] }
 0x128   : > { %v910_v37 = vpop.permute.xlu1 %909  ;;  %v908_v28 = vpop.permute.xlu0 %907  ;;  %v904_v51 = vrot.slane %v2222_v35, %v1495_v17  ;;  %v2224_v49 = vld [vmem:[#allocation16_spill] sm:$0xff]  ;;  %v2225_v12 = vld [vmem:[#allocation17_spill] sm:$0xff]  ;;  %v920_v32 = vrot.slane %v2222_v35, %v1504_v24  ;;  %v2230_v17 = vld [vmem:[#allocation23_spill] sm:$0xff] }
 0x129   : > { %v558_v19 = vadd.f32 %v556_v60, %v536_v14  ;;  %v574_v50 = vadd.f32 %v2211_v29, %v544_v44  ;;  %v557_v21 = vadd.f32 %v555_v3, %v535_v6  ;;  %v573_v18 = vadd.f32 %v2212_v61, %v543_v53  ;;  %v2226_v14 = vld [vmem:[#allocation19_spill] sm:$0xff]  ;;  %v2227_v6 = vld [vmem:[#allocation18_spill] sm:$0xff] }
 0x12b   : > { %v596_v42 = vadd.f32 %v2213_v41, %v558_v19  ;;  %v612_v11 = vadd.f32 %v2214_v7, %v574_v50  ;;  %v595_v45 = vadd.f32 %v2215_v40, %v557_v21  ;;  %v611_v23 = vadd.f32 %v2216_v58, %v573_v18  ;;  %v2228_v19 = vld [vmem:[#allocation21_spill] sm:$0xff]  ;;  %v2229_v50 = vld [vmem:[#allocation20_spill] sm:$0xff] }
 0x12c   : > { %v924_v27 = vpop.permute.xlu1 %923  ;;  %v922_v43 = vpop.permute.xlu0 %921  ;;  %v914_v18 = vmul.f32 %v910_v37, %v904_v51  ;;  %v934_v41 = vrot.slane %v2222_v35, %v1513_v31  ;;  %v2233_v58 = vld [vmem:[#allocation24_spill] sm:$0xff]  ;;  %v2237_v31 = vld [vmem:[#allocation30_spill] sm:$0xff] }
 0x12d   : > { %v634_v26 = vadd.f32 %v2217_v55, %v596_v42  ;;  %v650_v16 = vadd.f32 %v2218_v46, %v612_v11  ;;  %v633_v25 = vadd.f32 %v2219_v10, %v595_v45  ;;  %v649_v62 = vadd.f32 %v2220_v0, %v611_v23  ;;  %v2231_v42 = vld [vmem:[#allocation22_spill] sm:$0xff]  ;;  %v2232_v11 = vld [vmem:[#allocation25_spill] sm:$0xff] }
 0x12e   : > { %v913_v45 = vmul.f32 %v908_v28, %v904_v51  ;;  %v2234_v23 = vld [vmem:[#allocation29_spill] sm:$0xff]  ;;  %v948_v46 = vrot.slane %v2222_v35, %v1565_v57  ;;  %v927_v0 = vmul.f32 %v922_v43, %v920_v32 }
 0x12f   : > { %v672_v22 = vadd.f32 %v2221_v33, %v634_v26  ;;  %v688_v1 = vadd.f32 %v2223_v47, %v650_v16  ;;  %v671_v13 = vadd.f32 %v2224_v49, %v633_v25  ;;  %v687_v4 = vadd.f32 %v2225_v12, %v649_v62  ;;  %v2235_v16 = vld [vmem:[#allocation28_spill] sm:$0xff]  ;;  %v2236_v25 = vld [vmem:[#allocation31_spill] sm:$0xff] }
 0x130   : > { %v938_v60 = vpop.permute.xlu1 %937  ;;  %v936_v3 = vpop.permute.xlu0 %935  ;;  %v928_v26 = vmul.f32 %v924_v27, %v920_v32  ;;  %v962_v49 = vrot.slane %v2222_v35, %v1522_v39 }
 0x131   : > { %v726_v44 = vadd.f32 %v2226_v14, %v688_v1  ;;  %v710_v53 = vadd.f32 %v2227_v6, %v672_v22  ;;  %v725_v29 = vadd.f32 %v2228_v19, %v687_v4  ;;  %v709_v21 = vadd.f32 %v2229_v50, %v671_v13 }
 0x132   : > { %v942_v47 = vmul.f32 %v938_v60, %v934_v41  ;;  %v941_v51 = vmul.f32 %v936_v3, %v934_v41  ;;  %v969_v32 = vmul.f32 %v1941_v52, %v962_v49 }
 0x133   : > { %v764_v61 = vadd.f32 %v2230_v17, %v726_v44  ;;  %v748_v7 = vadd.f32 %v2231_v42, %v710_v53  ;;  %v763_v40 = vadd.f32 %v2232_v11, %v725_v29  ;;  %v747_v24 = vadd.f32 %v2233_v58, %v709_v21 }
 0x134   : > { %v952_v62 = vpop.permute.xlu1 %951  ;;  %v950_v1 = vpop.permute.xlu0 %949  ;;  %v970_v44 = vmul.f32 %v1939_v54, %v962_v49 }
 0x135   : > { %v802_v55 = vadd.f32 %v2234_v23, %v764_v61  ;;  %v786_v10 = vadd.f32 %v2235_v16, %v748_v7  ;;  %v801_v37 = vadd.f32 %v2236_v25, %v763_v40  ;;  %v785_v33 = vadd.f32 %v2237_v31, %v747_v24 }
 0x136   : > { %v956_v13 = vmul.f32 %v952_v62, %v948_v46  ;;  %v955_v57 = vmul.f32 %v950_v1, %v948_v46 }
 0x137   : > { %v916_v22 = vadd.f32 %v914_v18, %v802_v55  ;;  %v915_v28 = vadd.f32 %v913_v45, %v801_v37 }
 0x139   : > { %v930_v27 = vadd.f32 %v928_v26, %v916_v22  ;;  %v929_v12 = vadd.f32 %v927_v0, %v915_v28 }
 0x13b   : > { %v944_v4 = vadd.f32 %v942_v47, %v930_v27  ;;  %v943_v14 = vadd.f32 %v941_v51, %v929_v12 }
 0x13d   : > { %v958_v43 = vadd.f32 %v956_v13, %v944_v4  ;;  %v957_v6 = vadd.f32 %v955_v57, %v943_v14 }
 0x13f   : > { %v972_v60 = vadd.f32 %v970_v44, %v958_v43  ;;  %v971_v53 = vadd.f32 %v969_v32, %v957_v6 }
 0x141   : > { %v994_v3 = vadd.f32 %v1969_v30, %v972_v60  ;;  %v993_v19 = vadd.f32 %v1975_v38, %v971_v53 }
 0x143   : > { %v1016_v39 = vadd.f32 %v1988_v2, %v994_v3  ;;  %v1015_v35 = vadd.f32 %v1993_v48, %v993_v19  ;;  %v182_v2 = vld [vmem:[%s2166_s2] sm:$0x3] }
 0x144   : > { %v1194_v48 = vrot.slane %v182_v2, %v1475_v9 }
 0x145   : > { %v1038_v29 = vadd.f32 %v2005_v63, %v1016_v39  ;;  %v1037_v50 = vadd.f32 %v2016_v20, %v1015_v35 }
 0x147   : > { %v1060_v54 = vadd.f32 %v2028_v5, %v1038_v29  ;;  %v1059_v52 = vadd.f32 %v2032_v36, %v1037_v50 }
 0x149   : > { %v1082_v21 = vadd.f32 %v2048_v56, %v1060_v54  ;;  %v1081_v17 = vadd.f32 %v2050_v59, %v1059_v52 }
 0x14b   : > { %v1104_v30 = vadd.f32 %v2060_v34, %v1082_v21  ;;  %v1103_v38 = vadd.f32 %v2062_v15, %v1081_v17  ;;  %v1198_v34 = vrot.slane %v182_v2, %v1472_v8 }
 0x171   : > { %v1174_v63 = vpop.permute.xlu1 %1173  ;;  %v1172_v20 = vpop.permute.xlu0 %1171 }
 0x172   : > { %v1187_v5 = vsel %vm1185_vm0, %v786_v10, %v1174_v63  ;;  %v1186_v36 = vsel %vm1185_vm0, %v785_v33, %v1172_v20 }
 0x173   : > { %v1203_v56 = vadd.f32 %v1194_v48, %v1187_v5  ;;  %v1201_v59 = vadd.f32 %v1194_v48, %v1186_v36 }
 0x175   : > { %1207 = vst [vmem:[%s170_s9 + $0x10] sm:$0xff] %v1203_v56  ;;  %1205 = vst [vmem:[%s170_s9] sm:$0xff] %v1201_v59 }
 0x18b   : > { %v1182_v15 = vpop.permute.xlu1 %1181  ;;  %v1180_v9 = vpop.permute.xlu0 %1179 }
 0x18c   : > { %v1189_v61 = vsel %vm1185_vm0, %v1104_v30, %v1182_v15  ;;  %v1188_v41 = vsel %vm1185_vm0, %v1103_v38, %v1180_v9 }
 0x18d   : > { %v1204_v18 = vadd.f32 %v1198_v34, %v1189_v61  ;;  %v1202_v42 = vadd.f32 %v1198_v34, %v1188_v41 }
 0x18f   : > { %1208 = vst [vmem:[%s170_s9 + $0x18] sm:$0xff] %v1204_v18  ;;  %1206 = vst [vmem:[%s170_s9 + $0x8] sm:$0xff] %v1202_v42 }
 0x190 PF: > { %s13_s12 = sadd.s32 1, %s1306_s12  }
 0x191   : > { %p10_p4 = scmp.ge.s32.totalorder %s13_s12, 4  }
 0x193   :  { %12 = sbr.rel (!%p10_p4) target bundleno = 1 (0x1), region = 62 }

</bundles_post_ra>
